<compile_context>
chip_gen: v5e
topology: v5e:2x2
jax: 0.10.0
libtpu: 0.0.40
codegen_flags: <defaults>
</compile_context>

<pallas_src>
import functools

import jax
import jax.numpy as jnp
from jax.experimental import pallas as pl
from jax.experimental.pallas import tpu as pltpu

VGG11_CFG = [64, 'M', 128, 'M', 256, 256, 'M', 512, 512, 'M', 512, 512, 'M']
_VMEM_LIMIT = 48 * 1024 * 1024


# ----------------------------------------------------------------------------
# Fused Conv3x3(pad=1) + folded BatchNorm + ReLU [+ MaxPool 2x2/2] kernel.
#
# x_ref: (G, R, 9*Cin) bf16 im2col rows, G=1 (no pool) or G=4 (pool quadrants)
# w_ref: (9*Cin, Ct) bf16;  scale/shift: (1, Ct) f32;  o_ref: (R, Ct) bf16
# ----------------------------------------------------------------------------
def _conv_kernel(x_ref, w_ref, scale_ref, shift_ref, o_ref, *, pool):
    w = w_ref[...]
    scale = scale_ref[...]
    shift = shift_ref[...]

    def quadrant(g):
        acc = jnp.dot(x_ref[g], w, preferred_element_type=jnp.float32)
        return jnp.maximum(acc * scale + shift, 0.0)   # BN-affine + ReLU (f32)

    y = quadrant(0)
    if pool:                                           # max over 2x2 window
        for g in range(1, 4):
            y = jnp.maximum(y, quadrant(g))
    o_ref[...] = y.astype(o_ref.dtype)


def _im2col(x):
    """x: (N,H,W,C) -> (N,H,W,9C): 3x3 taps concatenated along channels."""
    n, h, w, c = x.shape
    xp = jnp.pad(x, ((0, 0), (1, 1), (1, 1), (0, 0)))
    taps = [xp[:, kh:kh + h, kw:kw + w, :]
            for kh in range(3) for kw in range(3)]
    return jnp.concatenate(taps, axis=-1)


def conv3x3_bn_relu(x, w9, scale, shift, *, pool):
    """x: (N,H,W,Cin) bf16; w9: (9*Cin,Cout) bf16; scale/shift: (1,Cout) f32."""
    n, h, wd, cin = x.shape
    k = 9 * cin
    cout = w9.shape[1]
    t = _im2col(x)                                      # (N,H,W,9Cin) glue only
    if pool:
        hp, wp = h // 2, wd // 2
        # Order rows as (pool quadrant, n, hp, wp) so the in-kernel pool is a
        # max over the G axis of the matmul outputs.
        t = t.reshape(n, hp, 2, wp, 2, k)
        t = jnp.transpose(t, (2, 4, 0, 1, 3, 5))        # (2,2,N,Hp,Wp,9Cin)
        xm = t.reshape(4, n * hp * wp, k)
        rows, ho, wo = n * hp * wp, hp, wp
    else:
        xm = t.reshape(1, n * h * wd, k)
        rows, ho, wo = n * h * wd, h, wd
    g = xm.shape[0]
    tc = cout if cout <= 128 else cout // 2             # lane-dense Cout tiles
    grid = (cout // tc,)
    out = pl.pallas_call(
        functools.partial(_conv_kernel, pool=pool),
        out_shape=jax.ShapeDtypeStruct((rows, cout), jnp.bfloat16),
        grid=grid,
        in_specs=[
            pl.BlockSpec((g, rows, k), lambda j: (0, 0, 0)),
            pl.BlockSpec((k, tc), lambda j: (0, j)),
            pl.BlockSpec((1, tc), lambda j: (0, j)),
            pl.BlockSpec((1, tc), lambda j: (0, j)),
        ],
        out_specs=pl.BlockSpec((rows, tc), lambda j: (0, j)),
        compiler_params=pltpu.CompilerParams(
            dimension_semantics=("parallel",),
            vmem_limit_bytes=_VMEM_LIMIT),
    )(xm, w9, scale, shift)
    return out.reshape(n, ho, wo, cout)


# ----------------------------------------------------------------------------
# Linear (+ optional ReLU): bf16 inputs/weights, f32 accumulation, large tiles
# ----------------------------------------------------------------------------
def _linear_kernel(x_ref, w_ref, b_ref, o_ref, acc_ref, *, apply_relu):
    k = pl.program_id(1)

    @pl.when(k == 0)
    def _():
        acc_ref[...] = jnp.zeros_like(acc_ref)

    acc_ref[...] += jnp.dot(x_ref[...], w_ref[...],
                            preferred_element_type=jnp.float32)

    @pl.when(k == pl.num_programs(1) - 1)
    def _():
        y = acc_ref[...] + b_ref[...]
        if apply_relu:
            y = jnp.maximum(y, 0.0)
        o_ref[...] = y.astype(o_ref.dtype)


def linear(x, w, b, *, relu, out_dtype, tn=2048, tk=2048):
    """x: (B, K) bf16; w: (K, N) bf16; b: (N,) f32."""
    bsz, kdim = x.shape
    ndim = w.shape[1]
    tn = min(tn, ndim)
    tk = min(tk, kdim)
    assert ndim % tn == 0 and kdim % tk == 0
    grid = (ndim // tn, kdim // tk)
    return pl.pallas_call(
        functools.partial(_linear_kernel, apply_relu=relu),
        out_shape=jax.ShapeDtypeStruct((bsz, ndim), out_dtype),
        grid=grid,
        in_specs=[
            pl.BlockSpec((bsz, tk), lambda j, k: (0, k)),
            pl.BlockSpec((tk, tn), lambda j, k: (k, j)),
            pl.BlockSpec((1, tn), lambda j, k: (0, j)),
        ],
        out_specs=pl.BlockSpec((bsz, tn), lambda j, k: (0, j)),
        scratch_shapes=[pltpu.VMEM((bsz, tn), jnp.float32)],
        compiler_params=pltpu.CompilerParams(
            dimension_semantics=("parallel", "arbitrary"),
            vmem_limit_bytes=_VMEM_LIMIT),
    )(x, w, b.reshape(1, ndim))


# ----------------------------------------------------------------------------
# Deterministic parameter init (mirrors VGGBase._initialize_weights shapes)
# ----------------------------------------------------------------------------
def init_params(key, num_classes=10):
    params = {'convs': [], 'fcs': []}
    in_c = 3
    eps = 1e-5
    for v in VGG11_CFG:
        if v == 'M':
            continue
        key, k1 = jax.random.split(key)
        fan_out = v * 3 * 3                      # kaiming_normal_, mode='fan_out'
        std = (2.0 / fan_out) ** 0.5
        w = jax.random.normal(k1, (3, 3, in_c, v), jnp.float32) * std
        bias = jnp.zeros((v,), jnp.float32)      # conv bias init 0
        gamma = jnp.ones((v,), jnp.float32)      # BN weight = 1
        beta = jnp.zeros((v,), jnp.float32)      # BN bias = 0
        run_mean = jnp.zeros((v,), jnp.float32)
        run_var = jnp.ones((v,), jnp.float32)
        scale = gamma / jnp.sqrt(run_var + eps)
        shift = (bias - run_mean) * scale + beta
        # (kh,kw,cin,cout) -> (9*cin, cout), matching im2col tap/channel order.
        w9 = w.reshape(9 * in_c, v).astype(jnp.bfloat16)
        params['convs'].append((w9, scale.reshape(1, v), shift.reshape(1, v)))
        in_c = v
    for din, dout in [(512, 4096), (4096, 4096), (4096, num_classes)]:
        key, k1 = jax.random.split(key)
        w = (jax.random.normal(k1, (din, dout), jnp.float32) * 0.01
             ).astype(jnp.bfloat16)              # N(0, 0.01)
        b = jnp.zeros((dout,), jnp.float32)
        params['fcs'].append((w, b))
    return params


# ----------------------------------------------------------------------------
# VGG11EDL forward: evidence = relu(classifier(avgpool(features(x))))
# ----------------------------------------------------------------------------
def vgg11_edl_forward(x_nchw, params):
    x = jnp.transpose(x_nchw, (0, 2, 3, 1)).astype(jnp.bfloat16)   # NCHW->NHWC
    ci = 0
    i = 0
    while i < len(VGG11_CFG):
        v = VGG11_CFG[i]
        assert v != 'M'
        pool = (i + 1 < len(VGG11_CFG)) and VGG11_CFG[i + 1] == 'M'
        w9, scale, shift = params['convs'][ci]
        ci += 1
        x = conv3x3_bn_relu(x, w9, scale, shift, pool=pool)
        i += 2 if pool else 1
    # AdaptiveAvgPool2d((1,1)) == mean over spatial; spatial is 1x1 here (glue).
    n, _, _, c = x.shape
    feat = jnp.mean(x.astype(jnp.float32).reshape(n, -1, c),
                    axis=1).astype(jnp.bfloat16)                   # (N, 512)
    # classifier (Dropout == identity at inference)
    w1, b1 = params['fcs'][0]
    h = linear(feat, w1, b1, relu=True, out_dtype=jnp.bfloat16)
    w2, b2 = params['fcs'][1]
    h = linear(h, w2, b2, relu=True, out_dtype=jnp.bfloat16)
    w3, b3 = params['fcs'][2]
    # logits -> F.relu -> evidence (kept in f32)
    evidence = linear(h, w3, b3, relu=True, out_dtype=jnp.float32)
    return evidence


if __name__ == "__main__":
    key = jax.random.PRNGKey(0)
    kx, kp = jax.random.split(key)
    # NCHW input like PyTorch; VGG11 has 5 pools so spatial must be >= 32.
    x = jax.random.normal(kx, (2, 3, 32, 32), jnp.float32)
    params = init_params(kp, num_classes=10)
    out = vgg11_edl_forward(x, params)
    out = jax.block_until_ready(out)
    assert out.shape == (2, 10), out.shape
    assert bool(jnp.all(jnp.isfinite(out))) and bool(jnp.all(out >= 0.0))
    print("KERNEL_OK")
</pallas_src>

<mosaic_0001>
module attributes {stable_mosaic.version = 11 : i64} {
  func.func @_conv_kernel(%arg0: i32, %arg1: memref<4x512x27xbf16, #tpu.memory_space<vmem>>, %arg2: memref<27x64xbf16, #tpu.memory_space<vmem>>, %arg3: memref<1x64xf32, #tpu.memory_space<vmem>>, %arg4: memref<1x64xf32, #tpu.memory_space<vmem>>, %arg5: memref<512x64xbf16, #tpu.memory_space<vmem>>) attributes {dimension_semantics = [#tpu.dimension_semantics<parallel>], iteration_bounds = array<i64: 1>, scalar_prefetch = 0 : i64, scratch_operands = 0 : i64, tpu.core_type = #tpu.core_type<tc>, window_params = [{pipeline_mode = #tpu.pipeline_mode<synchronous>, transform_indices = @transform_0, window_bounds = array<i64: 4, 512, 27>}, {transform_indices = @transform_1, window_bounds = array<i64: 27, 64>}, {transform_indices = @transform_2, window_bounds = array<i64: 1, 64>}, {transform_indices = @transform_3, window_bounds = array<i64: 1, 64>}, {transform_indices = @transform_4, window_bounds = array<i64: 512, 64>}]} {
    %c0 = arith.constant 0 : index
    %c0_0 = arith.constant 0 : index
    %0 = vector.load %arg2[%c0, %c0_0] : memref<27x64xbf16, #tpu.memory_space<vmem>>, vector<27x64xbf16>
    %c0_1 = arith.constant 0 : index
    %c0_2 = arith.constant 0 : index
    %1 = vector.load %arg3[%c0_1, %c0_2] : memref<1x64xf32, #tpu.memory_space<vmem>>, vector<1x64xf32>
    %c0_3 = arith.constant 0 : index
    %c0_4 = arith.constant 0 : index
    %2 = vector.load %arg4[%c0_3, %c0_4] : memref<1x64xf32, #tpu.memory_space<vmem>>, vector<1x64xf32>
    %c0_5 = arith.constant 0 : index
    %c0_6 = arith.constant 0 : index
    %c0_7 = arith.constant 0 : index
    %3 = vector.load %arg1[%c0_5, %c0_6, %c0_7] : memref<4x512x27xbf16, #tpu.memory_space<vmem>>, vector<1x512x27xbf16>
    %4 = vector.shape_cast %3 : vector<1x512x27xbf16> to vector<512x27xbf16>
    %cst = arith.constant dense<0.000000e+00> : vector<512x64xf32>
    %5 = tpu.matmul %4, %0, %cst {dimension_numbers = #tpu.dot_dimension_numbers<[1], [0], [0], [1], [0, 0, 1, 1], [], []>} : vector<512x27xbf16>, vector<27x64xbf16>, vector<512x64xf32> -> vector<512x64xf32>
    %6 = vector.broadcast %1 : vector<1x64xf32> to vector<512x64xf32>
    %7 = arith.mulf %5, %6 : vector<512x64xf32>
    %8 = vector.broadcast %2 : vector<1x64xf32> to vector<512x64xf32>
    %9 = arith.addf %7, %8 : vector<512x64xf32>
    %cst_8 = arith.constant 0.000000e+00 : f32
    %10 = vector.broadcast %cst_8 : f32 to vector<512x64xf32>
    %11 = arith.maximumf %9, %10 : vector<512x64xf32>
    %c1 = arith.constant 1 : index
    %c0_9 = arith.constant 0 : index
    %c0_10 = arith.constant 0 : index
    %12 = vector.load %arg1[%c1, %c0_9, %c0_10] : memref<4x512x27xbf16, #tpu.memory_space<vmem>>, vector<1x512x27xbf16>
    %13 = vector.shape_cast %12 : vector<1x512x27xbf16> to vector<512x27xbf16>
    %cst_11 = arith.constant dense<0.000000e+00> : vector<512x64xf32>
    %14 = tpu.matmul %13, %0, %cst_11 {dimension_numbers = #tpu.dot_dimension_numbers<[1], [0], [0], [1], [0, 0, 1, 1], [], []>} : vector<512x27xbf16>, vector<27x64xbf16>, vector<512x64xf32> -> vector<512x64xf32>
    %15 = vector.broadcast %1 : vector<1x64xf32> to vector<512x64xf32>
    %16 = arith.mulf %14, %15 : vector<512x64xf32>
    %17 = vector.broadcast %2 : vector<1x64xf32> to vector<512x64xf32>
    %18 = arith.addf %16, %17 : vector<512x64xf32>
    %cst_12 = arith.constant 0.000000e+00 : f32
    %19 = vector.broadcast %cst_12 : f32 to vector<512x64xf32>
    %20 = arith.maximumf %18, %19 : vector<512x64xf32>
    %21 = arith.maximumf %11, %20 : vector<512x64xf32>
    %c2 = arith.constant 2 : index
    %c0_13 = arith.constant 0 : index
    %c0_14 = arith.constant 0 : index
    %22 = vector.load %arg1[%c2, %c0_13, %c0_14] : memref<4x512x27xbf16, #tpu.memory_space<vmem>>, vector<1x512x27xbf16>
    %23 = vector.shape_cast %22 : vector<1x512x27xbf16> to vector<512x27xbf16>
    %cst_15 = arith.constant dense<0.000000e+00> : vector<512x64xf32>
    %24 = tpu.matmul %23, %0, %cst_15 {dimension_numbers = #tpu.dot_dimension_numbers<[1], [0], [0], [1], [0, 0, 1, 1], [], []>} : vector<512x27xbf16>, vector<27x64xbf16>, vector<512x64xf32> -> vector<512x64xf32>
    %25 = vector.broadcast %1 : vector<1x64xf32> to vector<512x64xf32>
    %26 = arith.mulf %24, %25 : vector<512x64xf32>
    %27 = vector.broadcast %2 : vector<1x64xf32> to vector<512x64xf32>
    %28 = arith.addf %26, %27 : vector<512x64xf32>
    %cst_16 = arith.constant 0.000000e+00 : f32
    %29 = vector.broadcast %cst_16 : f32 to vector<512x64xf32>
    %30 = arith.maximumf %28, %29 : vector<512x64xf32>
    %31 = arith.maximumf %21, %30 : vector<512x64xf32>
    %c3 = arith.constant 3 : index
    %c0_17 = arith.constant 0 : index
    %c0_18 = arith.constant 0 : index
    %32 = vector.load %arg1[%c3, %c0_17, %c0_18] : memref<4x512x27xbf16, #tpu.memory_space<vmem>>, vector<1x512x27xbf16>
    %33 = vector.shape_cast %32 : vector<1x512x27xbf16> to vector<512x27xbf16>
    %cst_19 = arith.constant dense<0.000000e+00> : vector<512x64xf32>
    %34 = tpu.matmul %33, %0, %cst_19 {dimension_numbers = #tpu.dot_dimension_numbers<[1], [0], [0], [1], [0, 0, 1, 1], [], []>} : vector<512x27xbf16>, vector<27x64xbf16>, vector<512x64xf32> -> vector<512x64xf32>
    %35 = vector.broadcast %1 : vector<1x64xf32> to vector<512x64xf32>
    %36 = arith.mulf %34, %35 : vector<512x64xf32>
    %37 = vector.broadcast %2 : vector<1x64xf32> to vector<512x64xf32>
    %38 = arith.addf %36, %37 : vector<512x64xf32>
    %cst_20 = arith.constant 0.000000e+00 : f32
    %39 = vector.broadcast %cst_20 : f32 to vector<512x64xf32>
    %40 = arith.maximumf %38, %39 : vector<512x64xf32>
    %41 = arith.maximumf %31, %40 : vector<512x64xf32>
    %42 = arith.truncf %41 : vector<512x64xf32> to vector<512x64xbf16>
    %c0_21 = arith.constant 0 : index
    %c0_22 = arith.constant 0 : index
    %43 = vector.load %arg5[%c0_21, %c0_22] : memref<512x64xbf16, #tpu.memory_space<vmem>>, vector<512x64xbf16>
    tpu.vector_store %arg5[%c0_21, %c0_22], %42 {strides = array<i32>} : memref<512x64xbf16, #tpu.memory_space<vmem>>, vector<512x64xbf16>,
    return
  }
  func.func @transform_0(%arg0: i32) -> (i32, i32, i32) {
    %c0_i32 = arith.constant 0 : i32
    %c0_i32_0 = arith.constant 0 : i32
    %c0_i32_1 = arith.constant 0 : i32
    %c0_i32_2 = arith.constant 0 : i32
    return %c0_i32, %c0_i32_0, %c0_i32_1 : i32, i32, i32
  }
  func.func @transform_1(%arg0: i32) -> (i32, i32) {
    %c0_i32 = arith.constant 0 : i32
    %c0_i32_0 = arith.constant 0 : i32
    return %c0_i32, %arg0 : i32, i32
  }
  func.func @transform_2(%arg0: i32) -> (i32, i32) {
    %c0_i32 = arith.constant 0 : i32
    %c0_i32_0 = arith.constant 0 : i32
    return %c0_i32, %arg0 : i32, i32
  }
  func.func @transform_3(%arg0: i32) -> (i32, i32) {
    %c0_i32 = arith.constant 0 : i32
    %c0_i32_0 = arith.constant 0 : i32
    return %c0_i32, %arg0 : i32, i32
  }
  func.func @transform_4(%arg0: i32) -> (i32, i32) {
    %c0_i32 = arith.constant 0 : i32
    %c0_i32_0 = arith.constant 0 : i32
    return %c0_i32, %arg0 : i32, i32
  }
}

</mosaic_0001>

<bundles_post_ra>
// kernel: tpu_custom_call.1
= control target key start
LH: loop header
LB: loop body
LE: loop exit
PB: predicated region body
PF: predicated region fallthrough
CT: control target
= control target key end

     0   :  { %vm356_vm0 = vcmask 1044480   ;;  %vm357_vm1 = vcmask 1045504   ;;  %v4078_v2 = vmov 65535   ;;  %vm259_vm2 = vcmask 220160   ;;  %s5423_s1 = inlined_call_operand.vmem [shape: bf16[27,64], index: 1, kind: input, shape index: {}]   ;;  %s5424_s2 = inlined_call_operand.vmem [shape: f32[1,64], index: 2, kind: input, shape index: {}]   ;;  %s5425_s3 = inlined_call_operand.vmem [shape: f32[1,64], index: 3, kind: input, shape index: {}]   ;;  %s5426_s0 = inlined_call_operand.vmem [shape: bf16[4,512,27], index: 0, kind: input, shape index: {}]   ;;  %s5427_s4 = inlined_call_operand.vmem [shape: bf16[512,64], index: 4, kind: output, shape index: {}]  }
   0x1   :  { %v3235_v0 = vld [vmem:[%s5423_s1 + $0x8] sm:$0xf]  ;;  %v3942_v1 = vld [vmem:[%s5423_s1 + $0x8] sm:$0x30]  ;;  %v358_v3 = vsel %vm356_vm0, 4294967295, %v4078_v2  ;;  %v3941_v7 = vld [vmem:[%s5423_s1] sm:$0xff] }
   0x2   :  { %v3236_v4 = vor.u32 %v3942_v1, %v3235_v0  ;;  %v359_v5 = vsel %vm357_vm1, %v358_v3, 0  ;;  %v3943_v8 = vld [vmem:[%s5426_s0] sm:$0xff]  ;;  %v3944_v12 = vld [vmem:[%s5426_s0 + $0x8] sm:$0xff]  ;;  %v3945_v16 = vld [vmem:[%s5426_s0 + $0x10] sm:$0xff]  ;;  %vm3032_vm3 = vcmask 519168  }
   0x3   :  { %v3975_v9 = vld [vmem:[%s5426_s0 + $0x100] sm:$0xff]  ;;  %v3976_v13 = vld [vmem:[%s5426_s0 + $0x108] sm:$0xff]  ;;  %v3977_v17 = vld [vmem:[%s5426_s0 + $0x110] sm:$0xff] }
   0x4   :  { %v361_v6 = vand.u32 %v3236_v4, %v359_v5  ;;  %v4007_v10 = vld [vmem:[%s5426_s0 + $0x200] sm:$0xff]  ;;  %v4008_v14 = vld [vmem:[%s5426_s0 + $0x208] sm:$0xff]  ;;  %v4009_v18 = vld [vmem:[%s5426_s0 + $0x210] sm:$0xff] }
   0x5   :  { %v4039_v11 = vld [vmem:[%s5426_s0 + $0x300] sm:$0xff]  ;;  %v4040_v15 = vld [vmem:[%s5426_s0 + $0x308] sm:$0xff]  ;;  %v4041_v19 = vld [vmem:[%s5426_s0 + $0x310] sm:$0xff] }
   0x6   :  { %369 = vmatpush.bf16.msra.mxu0 %v361_v6  ;;  %1057 = vmatpush.bf16.msra.mxu1 %v361_v6  ;;  %v3946_v20 = vld [vmem:[%s5426_s0 + $0x18] sm:$0xff]  ;;  %v3947_v24 = vld [vmem:[%s5426_s0 + $0x20] sm:$0xff]  ;;  %v3948_v28 = vld [vmem:[%s5426_s0 + $0x28] sm:$0xff] }
   0x7   :  { %1803 = vmatpush.bf16.msra.mxu2 %v361_v6  ;;  %2549 = vmatpush.bf16.msra.mxu3 %v361_v6  ;;  %v3978_v21 = vld [vmem:[%s5426_s0 + $0x118] sm:$0xff]  ;;  %v3979_v25 = vld [vmem:[%s5426_s0 + $0x120] sm:$0xff]  ;;  %v3980_v29 = vld [vmem:[%s5426_s0 + $0x128] sm:$0xff] }
   0x8   :  { %v4010_v22 = vld [vmem:[%s5426_s0 + $0x218] sm:$0xff]  ;;  %v4011_v26 = vld [vmem:[%s5426_s0 + $0x220] sm:$0xff]  ;;  %v4012_v30 = vld [vmem:[%s5426_s0 + $0x228] sm:$0xff] }
   0x9   :  { %v4042_v23 = vld [vmem:[%s5426_s0 + $0x318] sm:$0xff]  ;;  %v4043_v27 = vld [vmem:[%s5426_s0 + $0x320] sm:$0xff]  ;;  %v4044_v31 = vld [vmem:[%s5426_s0 + $0x328] sm:$0xff] }
   0xa   :  { %370 = vmatpush.bf16.msra.mxu0 %v3941_v7  ;;  %1058 = vmatpush.bf16.msra.mxu1 %v3941_v7  ;;  %v3949_v32 = vld [vmem:[%s5426_s0 + $0x30] sm:$0xff]  ;;  %v3950_v36 = vld [vmem:[%s5426_s0 + $0x38] sm:$0xff]  ;;  %v4244_v40 = vld [vmem:[%s5424_s2] ss:$0 sm:$0xff] }
   0xb   :  { %1804 = vmatpush.bf16.msra.mxu2 %v3941_v7  ;;  %2550 = vmatpush.bf16.msra.mxu3 %v3941_v7  ;;  %v3981_v33 = vld [vmem:[%s5426_s0 + $0x130] sm:$0xff]  ;;  %v3982_v37 = vld [vmem:[%s5426_s0 + $0x138] sm:$0xff]  ;;  %v4249_v41 = vld [vmem:[%s5425_s3] ss:$0 sm:$0xff] }
   0xc   :  { %v4013_v34 = vld [vmem:[%s5426_s0 + $0x230] sm:$0xff]  ;;  %v4014_v38 = vld [vmem:[%s5426_s0 + $0x238] sm:$0xff]  ;;  %v3951_v42 = vld [vmem:[%s5426_s0 + $0x40] sm:$0xff] }
   0xd   :  { %3237 = vmatmul.msk.bf16.vlgmr.msra.gmra.mxu0 %vm259_vm2, %v3943_v8  ;;  %3461 = vmatmul.msk.bf16.vlgmr.msra.gmra.mxu1 %vm259_vm2, %v3975_v9  ;;  %v4045_v35 = vld [vmem:[%s5426_s0 + $0x330] sm:$0xff]  ;;  %v4046_v39 = vld [vmem:[%s5426_s0 + $0x338] sm:$0xff]  ;;  %v3983_v43 = vld [vmem:[%s5426_s0 + $0x140] sm:$0xff] }
   0xe   :  { %3685 = vmatmul.msk.bf16.vlgmr.msra.gmra.mxu2 %vm259_vm2, %v4007_v10  ;;  %3909 = vmatmul.msk.bf16.vlgmr.msra.gmra.mxu3 %vm259_vm2, %v4039_v11  ;;  %v4015_v46 = vld [vmem:[%s5426_s0 + $0x240] sm:$0xff]  ;;  %v3952_v9 = vld [vmem:[%s5426_s0 + $0x48] sm:$0xff] }
   0xf   :  { %v4047_v47 = vld [vmem:[%s5426_s0 + $0x340] sm:$0xff]  ;;  %v3984_v10 = vld [vmem:[%s5426_s0 + $0x148] sm:$0xff] }
  0x1d   :  { %3238 = vmatmul.msk.bf16.gmra.mxu0 %vm259_vm2, %v3944_v12  ;;  %3462 = vmatmul.msk.bf16.gmra.mxu1 %vm259_vm2, %v3976_v13 }
  0x1e   :  { %3686 = vmatmul.msk.bf16.gmra.mxu2 %vm259_vm2, %v4008_v14  ;;  %3910 = vmatmul.msk.bf16.gmra.mxu3 %vm259_vm2, %v4040_v15 }
  0x2d   :  { %3239 = vmatmul.msk.bf16.gmra.mxu0 %vm259_vm2, %v3945_v16  ;;  %3463 = vmatmul.msk.bf16.gmra.mxu1 %vm259_vm2, %v3977_v17  ;;  %v4016_v17 = vld [vmem:[%s5426_s0 + $0x248] sm:$0xff] }
  0x2e   :  { %3687 = vmatmul.msk.bf16.gmra.mxu2 %vm259_vm2, %v4009_v18  ;;  %3911 = vmatmul.msk.bf16.gmra.mxu3 %vm259_vm2, %v4041_v19  ;;  %v4048_v18 = vld [vmem:[%s5426_s0 + $0x348] sm:$0xff] }
  0x3d   :  { %3240 = vmatmul.msk.bf16.gmra.mxu0 %vm259_vm2, %v3946_v20  ;;  %3464 = vmatmul.msk.bf16.gmra.mxu1 %vm259_vm2, %v3978_v21 }
  0x3e   :  { %3688 = vmatmul.msk.bf16.gmra.mxu2 %vm259_vm2, %v4010_v22  ;;  %3912 = vmatmul.msk.bf16.gmra.mxu3 %vm259_vm2, %v4042_v23 }
  0x4d   :  { %3241 = vmatmul.msk.bf16.gmra.mxu0 %vm259_vm2, %v3947_v24  ;;  %3465 = vmatmul.msk.bf16.gmra.mxu1 %vm259_vm2, %v3979_v25 }
  0x4e   :  { %3689 = vmatmul.msk.bf16.gmra.mxu2 %vm259_vm2, %v4011_v26  ;;  %3913 = vmatmul.msk.bf16.gmra.mxu3 %vm259_vm2, %v4043_v27 }
  0x5d   :  { %3242 = vmatmul.msk.bf16.gmra.mxu0 %vm259_vm2, %v3948_v28  ;;  %3466 = vmatmul.msk.bf16.gmra.mxu1 %vm259_vm2, %v3980_v29 }
  0x5e   :  { %3690 = vmatmul.msk.bf16.gmra.mxu2 %vm259_vm2, %v4012_v30  ;;  %3914 = vmatmul.msk.bf16.gmra.mxu3 %vm259_vm2, %v4044_v31 }
  0x6d   :  { %3243 = vmatmul.msk.bf16.gmra.mxu0 %vm259_vm2, %v3949_v32  ;;  %3467 = vmatmul.msk.bf16.gmra.mxu1 %vm259_vm2, %v3981_v33 }
  0x6e   :  { %3691 = vmatmul.msk.bf16.gmra.mxu2 %vm259_vm2, %v4013_v34  ;;  %3915 = vmatmul.msk.bf16.gmra.mxu3 %vm259_vm2, %v4045_v35 }
  0x7d   :  { %3244 = vmatmul.msk.bf16.gmra.mxu0 %vm259_vm2, %v3950_v36  ;;  %3468 = vmatmul.msk.bf16.gmra.mxu1 %vm259_vm2, %v3982_v37 }
  0x7e   :  { %3692 = vmatmul.msk.bf16.gmra.mxu2 %vm259_vm2, %v4014_v38  ;;  %3916 = vmatmul.msk.bf16.gmra.mxu3 %vm259_vm2, %v4046_v39 }
  0x8a   :  { %v372_v44 = vpop.f32.mrf.mxu0  ;;  %v1060_v45 = vpop.f32.mrf.mxu1 }
  0x8b   :  { %v535_v48 = vmul.f32 %v4244_v40, %v372_v44  ;;  %v1220_v49 = vmul.f32 %v4244_v40, %v1060_v45 }
  0x8d   :  { %v602_v50 = vadd.f32 %v4249_v41, %v535_v48  ;;  %v1284_v51 = vadd.f32 %v4249_v41, %v1220_v49  ;;  %3245 = vmatmul.msk.bf16.gmra.mxu0 %vm259_vm2, %v3951_v42  ;;  %3469 = vmatmul.msk.bf16.gmra.mxu1 %vm259_vm2, %v3983_v43 }
  0x8e   :  { %3693 = vmatmul.msk.bf16.gmra.mxu2 %vm259_vm2, %v4015_v46  ;;  %3917 = vmatmul.msk.bf16.gmra.mxu3 %vm259_vm2, %v4047_v47 }
  0x8f   :  { %v666_v52 = vmax.f32 %v602_v50, 0.0  ;;  %v1348_v53 = vmax.f32 %v1284_v51, 0.0 }
  0x91   :  { %v1806_v54 = vpop.f32.mrf.mxu2  ;;  %v2552_v55 = vpop.f32.mrf.mxu3  ;;  %v1412_v62 = vmax.f32 %v666_v52, %v1348_v53 }
  0x92   :  { %v1966_v56 = vmul.f32 %v4244_v40, %v1806_v54  ;;  %v2712_v57 = vmul.f32 %v4244_v40, %v2552_v55  ;;  %v374_v58 = vpop.f32.mrf.mxu0  ;;  %v1062_v59 = vpop.f32.mrf.mxu1  ;;  %v3953_v55 = vld [vmem:[%s5426_s0 + $0x50] sm:$0xff] }
  0x93   :  { %v536_v60 = vmul.f32 %v4244_v40, %v374_v58  ;;  %v1221_v61 = vmul.f32 %v4244_v40, %v1062_v59 }
  0x94   :  { %v2030_v63 = vadd.f32 %v4249_v41, %v1966_v56  ;;  %v2776_v0 = vadd.f32 %v4249_v41, %v2712_v57  ;;  %v3985_v56 = vld [vmem:[%s5426_s0 + $0x150] sm:$0xff] }
  0x95   :  { %v603_v1 = vadd.f32 %v4249_v41, %v536_v60  ;;  %v1285_v4 = vadd.f32 %v4249_v41, %v1221_v61 }
  0x96   :  { %v2094_v2 = vmax.f32 %v2030_v63, 0.0  ;;  %v2840_v3 = vmax.f32 %v2776_v0, 0.0  ;;  %v4017_v63 = vld [vmem:[%s5426_s0 + $0x250] sm:$0xff] }
  0x97   :  { %v667_v6 = vmax.f32 %v603_v1, 0.0  ;;  %v1349_v12 = vmax.f32 %v1285_v4, 0.0  ;;  %v4049_v0 = vld [vmem:[%s5426_s0 + $0x350] sm:$0xff] }
  0x98   :  { %v2158_v5 = vmax.f32 %v1412_v62, %v2094_v2 }
  0x99   :  { %v1808_v7 = vpop.f32.mrf.mxu2  ;;  %v2554_v8 = vpop.f32.mrf.mxu3  ;;  %v1413_v26 = vmax.f32 %v667_v6, %v1349_v12 }
  0x9a   :  { %v2904_v11 = vmax.f32 %v2158_v5, %v2840_v3  ;;  %v1967_v13 = vmul.f32 %v4244_v40, %v1808_v7  ;;  %v2713_v14 = vmul.f32 %v4244_v40, %v2554_v8  ;;  %v377_v15 = vpop.f32.mrf.mxu0  ;;  %v1065_v16 = vpop.f32.mrf.mxu1 }
  0x9b   :  { %v537_v19 = vmul.f32 %v4244_v40, %v377_v15  ;;  %v1222_v20 = vmul.f32 %v4244_v40, %v1065_v16 }
  0x9c   :  { %v2968_v21 = vpack.c.bf16 %v2904_v11, %v2904_v11  ;;  %v2031_v22 = vadd.f32 %v4249_v41, %v1967_v13  ;;  %v2777_v23 = vadd.f32 %v4249_v41, %v2713_v14 }
  0x9d   :  { %v604_v24 = vadd.f32 %v4249_v41, %v537_v19  ;;  %v1286_v25 = vadd.f32 %v4249_v41, %v1222_v20  ;;  %3246 = vmatmul.msk.bf16.gmra.mxu0 %vm259_vm2, %v3952_v9  ;;  %3470 = vmatmul.msk.bf16.gmra.mxu1 %vm259_vm2, %v3984_v10 }
  0x9e   :  { %3033 = vst.msk [vmem:[%s5427_s4] sm:$0xf] %vm3032_vm3, %v2968_v21  ;;  %v2095_v27 = vmax.f32 %v2031_v22, 0.0  ;;  %3694 = vmatmul.msk.bf16.gmra.mxu2 %vm259_vm2, %v4016_v17  ;;  %3918 = vmatmul.msk.bf16.gmra.mxu3 %vm259_vm2, %v4048_v18  ;;  %v2841_v29 = vmax.f32 %v2777_v23, 0.0 }
  0x9f   :  { %v668_v30 = vmax.f32 %v604_v24, 0.0  ;;  %v1350_v31 = vmax.f32 %v1286_v25, 0.0 }
  0xa0   :  { %v2159_v28 = vmax.f32 %v1413_v26, %v2095_v27 }
  0xa1   :  { %v1811_v32 = vpop.f32.mrf.mxu2  ;;  %v2557_v33 = vpop.f32.mrf.mxu3  ;;  %v1414_v44 = vmax.f32 %v668_v30, %v1350_v31 }
  0xa2   :  { %v2905_v34 = vmax.f32 %v2159_v28, %v2841_v29  ;;  %v1968_v35 = vmul.f32 %v4244_v40, %v1811_v32  ;;  %v2714_v36 = vmul.f32 %v4244_v40, %v2557_v33  ;;  %v379_v37 = vpop.f32.mrf.mxu0  ;;  %v1067_v38 = vpop.f32.mrf.mxu1 }
  0xa3   :  { %v538_v39 = vmul.f32 %v4244_v40, %v379_v37  ;;  %v1223_v42 = vmul.f32 %v4244_v40, %v1067_v38 }
  0xa4   :  { %v2969_v43 = vpack.c.bf16 %v2905_v34, %v2905_v34  ;;  %v2032_v45 = vadd.f32 %v4249_v41, %v1968_v35  ;;  %v2778_v46 = vadd.f32 %v4249_v41, %v2714_v36  ;;  %v3954_v35 = vld [vmem:[%s5426_s0 + $0x58] sm:$0xff] }
  0xa5   :  { %v605_v47 = vadd.f32 %v4249_v41, %v538_v39  ;;  %v1287_v50 = vadd.f32 %v4249_v41, %v1223_v42  ;;  %v3986_v36 = vld [vmem:[%s5426_s0 + $0x158] sm:$0xff] }
  0xa6   :  { %3034 = vst.msk [vmem:[%s5427_s4 + $0x4] sm:$0xf] %vm3032_vm3, %v2969_v43  ;;  %v2096_v48 = vmax.f32 %v2032_v45, 0.0  ;;  %v2842_v49 = vmax.f32 %v2778_v46, 0.0  ;;  %v4018_v45 = vld [vmem:[%s5426_s0 + $0x258] sm:$0xff] }
  0xa7   :  { %v669_v52 = vmax.f32 %v605_v47, 0.0  ;;  %v1351_v58 = vmax.f32 %v1287_v50, 0.0  ;;  %v4050_v46 = vld [vmem:[%s5426_s0 + $0x358] sm:$0xff] }
  0xa8   :  { %v2160_v51 = vmax.f32 %v1414_v44, %v2096_v48 }
  0xa9   :  { %v1813_v53 = vpop.f32.mrf.mxu2  ;;  %v2559_v54 = vpop.f32.mrf.mxu3  ;;  %v1415_v8 = vmax.f32 %v669_v52, %v1351_v58 }
  0xaa   :  { %v2906_v57 = vmax.f32 %v2160_v51, %v2842_v49  ;;  %v1969_v59 = vmul.f32 %v4244_v40, %v1813_v53  ;;  %v2715_v60 = vmul.f32 %v4244_v40, %v2559_v54  ;;  %v382_v61 = vpop.f32.mrf.mxu0  ;;  %v1070_v62 = vpop.f32.mrf.mxu1 }
  0xab   :  { %v539_v1 = vmul.f32 %v4244_v40, %v382_v61  ;;  %v1224_v2 = vmul.f32 %v4244_v40, %v1070_v62 }
  0xac   :  { %v2970_v3 = vpack.c.bf16 %v2906_v57, %v2906_v57  ;;  %v2033_v4 = vadd.f32 %v4249_v41, %v1969_v59  ;;  %v2779_v5 = vadd.f32 %v4249_v41, %v2715_v60 }
  0xad   :  { %v606_v6 = vadd.f32 %v4249_v41, %v539_v1  ;;  %v1288_v7 = vadd.f32 %v4249_v41, %v1224_v2  ;;  %3247 = vmatmul.msk.bf16.gmra.mxu0 %vm259_vm2, %v3953_v55  ;;  %3471 = vmatmul.msk.bf16.gmra.mxu1 %vm259_vm2, %v3985_v56 }
  0xae   :  { %3035 = vst.msk [vmem:[%s5427_s4 + $0x8] sm:$0xf] %vm3032_vm3, %v2970_v3  ;;  %v2097_v9 = vmax.f32 %v2033_v4, 0.0  ;;  %3695 = vmatmul.msk.bf16.gmra.mxu2 %vm259_vm2, %v4017_v63  ;;  %3919 = vmatmul.msk.bf16.gmra.mxu3 %vm259_vm2, %v4049_v0  ;;  %v2843_v11 = vmax.f32 %v2779_v5, 0.0 }
  0xaf   :  { %v670_v12 = vmax.f32 %v606_v6, 0.0  ;;  %v1352_v13 = vmax.f32 %v1288_v7, 0.0 }
  0xb0   :  { %v2161_v10 = vmax.f32 %v1415_v8, %v2097_v9 }
  0xb1   :  { %v1816_v14 = vpop.f32.mrf.mxu2  ;;  %v2562_v15 = vpop.f32.mrf.mxu3  ;;  %v1416_v24 = vmax.f32 %v670_v12, %v1352_v13 }
  0xb2   :  { %v2907_v16 = vmax.f32 %v2161_v10, %v2843_v11  ;;  %v1970_v17 = vmul.f32 %v4244_v40, %v1816_v14  ;;  %v2716_v18 = vmul.f32 %v4244_v40, %v2562_v15  ;;  %v384_v19 = vpop.f32.mrf.mxu0  ;;  %v1072_v20 = vpop.f32.mrf.mxu1 }
  0xb3   :  { %v540_v21 = vmul.f32 %v4244_v40, %v384_v19  ;;  %v1225_v22 = vmul.f32 %v4244_v40, %v1072_v20 }
  0xb4   :  { %v2971_v23 = vpack.c.bf16 %v2907_v16, %v2907_v16  ;;  %v2034_v25 = vadd.f32 %v4249_v41, %v1970_v17  ;;  %v2780_v26 = vadd.f32 %v4249_v41, %v2716_v18  ;;  %v3955_v17 = vld [vmem:[%s5426_s0 + $0x60] sm:$0xff] }
  0xb5   :  { %v607_v27 = vadd.f32 %v4249_v41, %v540_v21  ;;  %v1289_v30 = vadd.f32 %v4249_v41, %v1225_v22  ;;  %v3987_v18 = vld [vmem:[%s5426_s0 + $0x160] sm:$0xff] }
  0xb6   :  { %3036 = vst.msk [vmem:[%s5427_s4 + $0xc] sm:$0xf] %vm3032_vm3, %v2971_v23  ;;  %v2098_v28 = vmax.f32 %v2034_v25, 0.0  ;;  %v2844_v29 = vmax.f32 %v2780_v26, 0.0  ;;  %v4019_v25 = vld [vmem:[%s5426_s0 + $0x260] sm:$0xff] }
  0xb7   :  { %v671_v32 = vmax.f32 %v607_v27, 0.0  ;;  %v1353_v38 = vmax.f32 %v1289_v30, 0.0  ;;  %v4051_v26 = vld [vmem:[%s5426_s0 + $0x360] sm:$0xff] }
  0xb8   :  { %v2162_v31 = vmax.f32 %v1416_v24, %v2098_v28 }
  0xb9   :  { %v1818_v33 = vpop.f32.mrf.mxu2  ;;  %v2564_v34 = vpop.f32.mrf.mxu3  ;;  %v1417_v54 = vmax.f32 %v671_v32, %v1353_v38 }
  0xba   :  { %v2908_v37 = vmax.f32 %v2162_v31, %v2844_v29  ;;  %v1971_v39 = vmul.f32 %v4244_v40, %v1818_v33  ;;  %v2717_v42 = vmul.f32 %v4244_v40, %v2564_v34  ;;  %v387_v43 = vpop.f32.mrf.mxu0  ;;  %v1075_v44 = vpop.f32.mrf.mxu1 }
  0xbb   :  { %v541_v47 = vmul.f32 %v4244_v40, %v387_v43  ;;  %v1226_v48 = vmul.f32 %v4244_v40, %v1075_v44 }
  0xbc   :  { %v2972_v49 = vpack.c.bf16 %v2908_v37, %v2908_v37  ;;  %v2035_v50 = vadd.f32 %v4249_v41, %v1971_v39  ;;  %v2781_v51 = vadd.f32 %v4249_v41, %v2717_v42 }
  0xbd   :  { %v608_v52 = vadd.f32 %v4249_v41, %v541_v47  ;;  %v1290_v53 = vadd.f32 %v4249_v41, %v1226_v48  ;;  %3248 = vmatmul.msk.bf16.gmra.mxu0 %vm259_vm2, %v3954_v35  ;;  %3472 = vmatmul.msk.bf16.gmra.mxu1 %vm259_vm2, %v3986_v36 }
  0xbe   :  { %3037 = vst.msk [vmem:[%s5427_s4 + $0x10] sm:$0xf] %vm3032_vm3, %v2972_v49  ;;  %v2099_v55 = vmax.f32 %v2035_v50, 0.0  ;;  %3696 = vmatmul.msk.bf16.gmra.mxu2 %vm259_vm2, %v4018_v45  ;;  %3920 = vmatmul.msk.bf16.gmra.mxu3 %vm259_vm2, %v4050_v46  ;;  %v2845_v57 = vmax.f32 %v2781_v51, 0.0 }
  0xbf   :  { %v672_v58 = vmax.f32 %v608_v52, 0.0  ;;  %v1354_v59 = vmax.f32 %v1290_v53, 0.0 }
  0xc0   :  { %v2163_v56 = vmax.f32 %v1417_v54, %v2099_v55 }
  0xc1   :  { %v1821_v60 = vpop.f32.mrf.mxu2  ;;  %v2567_v61 = vpop.f32.mrf.mxu3  ;;  %v1418_v6 = vmax.f32 %v672_v58, %v1354_v59 }
  0xc2   :  { %v2909_v62 = vmax.f32 %v2163_v56, %v2845_v57  ;;  %v1972_v63 = vmul.f32 %v4244_v40, %v1821_v60  ;;  %v2718_v0 = vmul.f32 %v4244_v40, %v2567_v61  ;;  %v389_v1 = vpop.f32.mrf.mxu0  ;;  %v1077_v2 = vpop.f32.mrf.mxu1 }
  0xc3   :  { %v542_v3 = vmul.f32 %v4244_v40, %v389_v1  ;;  %v1227_v4 = vmul.f32 %v4244_v40, %v1077_v2 }
  0xc4   :  { %v2973_v5 = vpack.c.bf16 %v2909_v62, %v2909_v62  ;;  %v2036_v7 = vadd.f32 %v4249_v41, %v1972_v63  ;;  %v2782_v8 = vadd.f32 %v4249_v41, %v2718_v0  ;;  %v3956_v63 = vld [vmem:[%s5426_s0 + $0x68] sm:$0xff] }
  0xc5   :  { %v609_v9 = vadd.f32 %v4249_v41, %v542_v3  ;;  %v1291_v12 = vadd.f32 %v4249_v41, %v1227_v4  ;;  %v3988_v0 = vld [vmem:[%s5426_s0 + $0x168] sm:$0xff] }
  0xc6   :  { %3038 = vst.msk [vmem:[%s5427_s4 + $0x14] sm:$0xf] %vm3032_vm3, %v2973_v5  ;;  %v2100_v10 = vmax.f32 %v2036_v7, 0.0  ;;  %v2846_v11 = vmax.f32 %v2782_v8, 0.0  ;;  %v4020_v7 = vld [vmem:[%s5426_s0 + $0x268] sm:$0xff] }
  0xc7   :  { %v673_v14 = vmax.f32 %v609_v9, 0.0  ;;  %v1355_v20 = vmax.f32 %v1291_v12, 0.0  ;;  %v4052_v8 = vld [vmem:[%s5426_s0 + $0x368] sm:$0xff] }
  0xc8   :  { %v2164_v13 = vmax.f32 %v1418_v6, %v2100_v10 }
  0xc9   :  { %v1823_v15 = vpop.f32.mrf.mxu2  ;;  %v2569_v16 = vpop.f32.mrf.mxu3  ;;  %v1419_v34 = vmax.f32 %v673_v14, %v1355_v20 }
  0xca   :  { %v2910_v19 = vmax.f32 %v2164_v13, %v2846_v11  ;;  %v1973_v21 = vmul.f32 %v4244_v40, %v1823_v15  ;;  %v2719_v22 = vmul.f32 %v4244_v40, %v2569_v16  ;;  %v392_v23 = vpop.f32.mrf.mxu0  ;;  %v1080_v24 = vpop.f32.mrf.mxu1 }
  0xcb   :  { %v543_v27 = vmul.f32 %v4244_v40, %v392_v23  ;;  %v1228_v28 = vmul.f32 %v4244_v40, %v1080_v24 }
  0xcc   :  { %v2974_v29 = vpack.c.bf16 %v2910_v19, %v2910_v19  ;;  %v2037_v30 = vadd.f32 %v4249_v41, %v1973_v21  ;;  %v2783_v31 = vadd.f32 %v4249_v41, %v2719_v22 }
  0xcd   :  { %v610_v32 = vadd.f32 %v4249_v41, %v543_v27  ;;  %v1292_v33 = vadd.f32 %v4249_v41, %v1228_v28  ;;  %3249 = vmatmul.msk.bf16.gmra.mxu0 %vm259_vm2, %v3955_v17  ;;  %3473 = vmatmul.msk.bf16.gmra.mxu1 %vm259_vm2, %v3987_v18 }
  0xce   :  { %3039 = vst.msk [vmem:[%s5427_s4 + $0x18] sm:$0xf] %vm3032_vm3, %v2974_v29  ;;  %v2101_v35 = vmax.f32 %v2037_v30, 0.0  ;;  %3697 = vmatmul.msk.bf16.gmra.mxu2 %vm259_vm2, %v4019_v25  ;;  %3921 = vmatmul.msk.bf16.gmra.mxu3 %vm259_vm2, %v4051_v26  ;;  %v2847_v37 = vmax.f32 %v2783_v31, 0.0 }
  0xcf   :  { %v674_v38 = vmax.f32 %v610_v32, 0.0  ;;  %v1356_v39 = vmax.f32 %v1292_v33, 0.0 }
  0xd0   :  { %v2165_v36 = vmax.f32 %v1419_v34, %v2101_v35 }
  0xd1   :  { %v1826_v42 = vpop.f32.mrf.mxu2  ;;  %v2572_v43 = vpop.f32.mrf.mxu3  ;;  %v1420_v52 = vmax.f32 %v674_v38, %v1356_v39 }
  0xd2   :  { %v2911_v44 = vmax.f32 %v2165_v36, %v2847_v37  ;;  %v1974_v45 = vmul.f32 %v4244_v40, %v1826_v42  ;;  %v2720_v46 = vmul.f32 %v4244_v40, %v2572_v43  ;;  %v394_v47 = vpop.f32.mrf.mxu0  ;;  %v1082_v48 = vpop.f32.mrf.mxu1 }
  0xd3   :  { %v544_v49 = vmul.f32 %v4244_v40, %v394_v47  ;;  %v1229_v50 = vmul.f32 %v4244_v40, %v1082_v48 }
  0xd4   :  { %v2975_v51 = vpack.c.bf16 %v2911_v44, %v2911_v44  ;;  %v2038_v53 = vadd.f32 %v4249_v41, %v1974_v45  ;;  %v2784_v54 = vadd.f32 %v4249_v41, %v2720_v46  ;;  %v3957_v45 = vld [vmem:[%s5426_s0 + $0x70] sm:$0xff] }
  0xd5   :  { %v611_v55 = vadd.f32 %v4249_v41, %v544_v49  ;;  %v1293_v58 = vadd.f32 %v4249_v41, %v1229_v50  ;;  %v3989_v46 = vld [vmem:[%s5426_s0 + $0x170] sm:$0xff] }
  0xd6   :  { %3040 = vst.msk [vmem:[%s5427_s4 + $0x1c] sm:$0xf] %vm3032_vm3, %v2975_v51  ;;  %v2102_v56 = vmax.f32 %v2038_v53, 0.0  ;;  %v2848_v57 = vmax.f32 %v2784_v54, 0.0  ;;  %v4021_v53 = vld [vmem:[%s5426_s0 + $0x270] sm:$0xff] }
  0xd7   :  { %v675_v60 = vmax.f32 %v611_v55, 0.0  ;;  %v1357_v2 = vmax.f32 %v1293_v58, 0.0  ;;  %v4053_v54 = vld [vmem:[%s5426_s0 + $0x370] sm:$0xff] }
  0xd8   :  { %v2166_v59 = vmax.f32 %v1420_v52, %v2102_v56 }
  0xd9   :  { %v1828_v61 = vpop.f32.mrf.mxu2  ;;  %v2574_v62 = vpop.f32.mrf.mxu3  ;;  %v1421_v16 = vmax.f32 %v675_v60, %v1357_v2 }
  0xda   :  { %v2912_v1 = vmax.f32 %v2166_v59, %v2848_v57  ;;  %v1975_v3 = vmul.f32 %v4244_v40, %v1828_v61  ;;  %v2721_v4 = vmul.f32 %v4244_v40, %v2574_v62  ;;  %v397_v5 = vpop.f32.mrf.mxu0  ;;  %v1085_v6 = vpop.f32.mrf.mxu1 }
  0xdb   :  { %v545_v9 = vmul.f32 %v4244_v40, %v397_v5  ;;  %v1230_v10 = vmul.f32 %v4244_v40, %v1085_v6 }
  0xdc   :  { %v2976_v11 = vpack.c.bf16 %v2912_v1, %v2912_v1  ;;  %v2039_v12 = vadd.f32 %v4249_v41, %v1975_v3  ;;  %v2785_v13 = vadd.f32 %v4249_v41, %v2721_v4 }
  0xdd   :  { %v612_v14 = vadd.f32 %v4249_v41, %v545_v9  ;;  %v1294_v15 = vadd.f32 %v4249_v41, %v1230_v10  ;;  %3250 = vmatmul.msk.bf16.gmra.mxu0 %vm259_vm2, %v3956_v63  ;;  %3474 = vmatmul.msk.bf16.gmra.mxu1 %vm259_vm2, %v3988_v0 }
  0xde   :  { %3041 = vst.msk [vmem:[%s5427_s4 + $0x20] sm:$0xf] %vm3032_vm3, %v2976_v11  ;;  %v2103_v17 = vmax.f32 %v2039_v12, 0.0  ;;  %3698 = vmatmul.msk.bf16.gmra.mxu2 %vm259_vm2, %v4020_v7  ;;  %3922 = vmatmul.msk.bf16.gmra.mxu3 %vm259_vm2, %v4052_v8  ;;  %v2849_v19 = vmax.f32 %v2785_v13, 0.0 }
  0xdf   :  { %v676_v20 = vmax.f32 %v612_v14, 0.0  ;;  %v1358_v21 = vmax.f32 %v1294_v15, 0.0 }
  0xe0   :  { %v2167_v18 = vmax.f32 %v1421_v16, %v2103_v17 }
  0xe1   :  { %v1831_v22 = vpop.f32.mrf.mxu2  ;;  %v2577_v23 = vpop.f32.mrf.mxu3  ;;  %v1422_v32 = vmax.f32 %v676_v20, %v1358_v21 }
  0xe2   :  { %v2913_v24 = vmax.f32 %v2167_v18, %v2849_v19  ;;  %v1976_v25 = vmul.f32 %v4244_v40, %v1831_v22  ;;  %v2722_v26 = vmul.f32 %v4244_v40, %v2577_v23  ;;  %v399_v27 = vpop.f32.mrf.mxu0  ;;  %v1087_v28 = vpop.f32.mrf.mxu1 }
  0xe3   :  { %v546_v29 = vmul.f32 %v4244_v40, %v399_v27  ;;  %v1231_v30 = vmul.f32 %v4244_v40, %v1087_v28 }
  0xe4   :  { %v2977_v31 = vpack.c.bf16 %v2913_v24, %v2913_v24  ;;  %v2040_v33 = vadd.f32 %v4249_v41, %v1976_v25  ;;  %v2786_v34 = vadd.f32 %v4249_v41, %v2722_v26  ;;  %v3958_v25 = vld [vmem:[%s5426_s0 + $0x78] sm:$0xff] }
  0xe5   :  { %v613_v35 = vadd.f32 %v4249_v41, %v546_v29  ;;  %v1295_v38 = vadd.f32 %v4249_v41, %v1231_v30  ;;  %v3990_v26 = vld [vmem:[%s5426_s0 + $0x178] sm:$0xff] }
  0xe6   :  { %3042 = vst.msk [vmem:[%s5427_s4 + $0x24] sm:$0xf] %vm3032_vm3, %v2977_v31  ;;  %v2104_v36 = vmax.f32 %v2040_v33, 0.0  ;;  %v2850_v37 = vmax.f32 %v2786_v34, 0.0  ;;  %v4022_v33 = vld [vmem:[%s5426_s0 + $0x278] sm:$0xff] }
  0xe7   :  { %v677_v42 = vmax.f32 %v613_v35, 0.0  ;;  %v1359_v48 = vmax.f32 %v1295_v38, 0.0  ;;  %v4054_v34 = vld [vmem:[%s5426_s0 + $0x378] sm:$0xff] }
  0xe8   :  { %v2168_v39 = vmax.f32 %v1422_v32, %v2104_v36 }
  0xe9   :  { %v1833_v43 = vpop.f32.mrf.mxu2  ;;  %v2579_v44 = vpop.f32.mrf.mxu3  ;;  %v1423_v62 = vmax.f32 %v677_v42, %v1359_v48 }
  0xea   :  { %v2914_v47 = vmax.f32 %v2168_v39, %v2850_v37  ;;  %v1977_v49 = vmul.f32 %v4244_v40, %v1833_v43  ;;  %v2723_v50 = vmul.f32 %v4244_v40, %v2579_v44  ;;  %v402_v51 = vpop.f32.mrf.mxu0  ;;  %v1090_v52 = vpop.f32.mrf.mxu1 }
  0xeb   :  { %v547_v55 = vmul.f32 %v4244_v40, %v402_v51  ;;  %v1232_v56 = vmul.f32 %v4244_v40, %v1090_v52 }
  0xec   :  { %v2978_v57 = vpack.c.bf16 %v2914_v47, %v2914_v47  ;;  %v2041_v58 = vadd.f32 %v4249_v41, %v1977_v49  ;;  %v2787_v59 = vadd.f32 %v4249_v41, %v2723_v50 }
  0xed   :  { %v614_v60 = vadd.f32 %v4249_v41, %v547_v55  ;;  %v1296_v61 = vadd.f32 %v4249_v41, %v1232_v56  ;;  %3251 = vmatmul.msk.bf16.gmra.mxu0 %vm259_vm2, %v3957_v45  ;;  %3475 = vmatmul.msk.bf16.gmra.mxu1 %vm259_vm2, %v3989_v46 }
  0xee   :  { %3043 = vst.msk [vmem:[%s5427_s4 + $0x28] sm:$0xf] %vm3032_vm3, %v2978_v57  ;;  %v2105_v63 = vmax.f32 %v2041_v58, 0.0  ;;  %3699 = vmatmul.msk.bf16.gmra.mxu2 %vm259_vm2, %v4021_v53  ;;  %3923 = vmatmul.msk.bf16.gmra.mxu3 %vm259_vm2, %v4053_v54  ;;  %v2851_v1 = vmax.f32 %v2787_v59, 0.0 }
  0xef   :  { %v678_v2 = vmax.f32 %v614_v60, 0.0  ;;  %v1360_v3 = vmax.f32 %v1296_v61, 0.0 }
  0xf0   :  { %v2169_v0 = vmax.f32 %v1423_v62, %v2105_v63 }
  0xf1   :  { %v1836_v4 = vpop.f32.mrf.mxu2  ;;  %v2582_v5 = vpop.f32.mrf.mxu3  ;;  %v1424_v14 = vmax.f32 %v678_v2, %v1360_v3 }
  0xf2   :  { %v2915_v6 = vmax.f32 %v2169_v0, %v2851_v1  ;;  %v1978_v7 = vmul.f32 %v4244_v40, %v1836_v4  ;;  %v2724_v8 = vmul.f32 %v4244_v40, %v2582_v5  ;;  %v404_v9 = vpop.f32.mrf.mxu0  ;;  %v1092_v10 = vpop.f32.mrf.mxu1 }
  0xf3   :  { %v548_v11 = vmul.f32 %v4244_v40, %v404_v9  ;;  %v1233_v12 = vmul.f32 %v4244_v40, %v1092_v10 }
  0xf4   :  { %v2979_v13 = vpack.c.bf16 %v2915_v6, %v2915_v6  ;;  %v2042_v15 = vadd.f32 %v4249_v41, %v1978_v7  ;;  %v2788_v16 = vadd.f32 %v4249_v41, %v2724_v8  ;;  %v3959_v7 = vld [vmem:[%s5426_s0 + $0x80] sm:$0xff] }
  0xf5   :  { %v615_v17 = vadd.f32 %v4249_v41, %v548_v11  ;;  %v1297_v20 = vadd.f32 %v4249_v41, %v1233_v12  ;;  %v3991_v8 = vld [vmem:[%s5426_s0 + $0x180] sm:$0xff] }
  0xf6   :  { %3044 = vst.msk [vmem:[%s5427_s4 + $0x2c] sm:$0xf] %vm3032_vm3, %v2979_v13  ;;  %v2106_v18 = vmax.f32 %v2042_v15, 0.0  ;;  %v2852_v19 = vmax.f32 %v2788_v16, 0.0  ;;  %v4023_v15 = vld [vmem:[%s5426_s0 + $0x280] sm:$0xff] }
  0xf7   :  { %v679_v22 = vmax.f32 %v615_v17, 0.0  ;;  %v1361_v28 = vmax.f32 %v1297_v20, 0.0  ;;  %v4055_v16 = vld [vmem:[%s5426_s0 + $0x380] sm:$0xff] }
  0xf8   :  { %v2170_v21 = vmax.f32 %v1424_v14, %v2106_v18 }
  0xf9   :  { %v1838_v23 = vpop.f32.mrf.mxu2  ;;  %v2584_v24 = vpop.f32.mrf.mxu3  ;;  %v1425_v44 = vmax.f32 %v679_v22, %v1361_v28 }
  0xfa   :  { %v2916_v27 = vmax.f32 %v2170_v21, %v2852_v19  ;;  %v1979_v29 = vmul.f32 %v4244_v40, %v1838_v23  ;;  %v2725_v30 = vmul.f32 %v4244_v40, %v2584_v24  ;;  %v407_v31 = vpop.f32.mrf.mxu0  ;;  %v1095_v32 = vpop.f32.mrf.mxu1 }
  0xfb   :  { %v549_v35 = vmul.f32 %v4244_v40, %v407_v31  ;;  %v1234_v36 = vmul.f32 %v4244_v40, %v1095_v32 }
  0xfc   :  { %v2980_v37 = vpack.c.bf16 %v2916_v27, %v2916_v27  ;;  %v2043_v38 = vadd.f32 %v4249_v41, %v1979_v29  ;;  %v2789_v39 = vadd.f32 %v4249_v41, %v2725_v30 }
  0xfd   :  { %v616_v42 = vadd.f32 %v4249_v41, %v549_v35  ;;  %v1298_v43 = vadd.f32 %v4249_v41, %v1234_v36  ;;  %3252 = vmatmul.msk.bf16.gmra.mxu0 %vm259_vm2, %v3958_v25  ;;  %3476 = vmatmul.msk.bf16.gmra.mxu1 %vm259_vm2, %v3990_v26 }
  0xfe   :  { %3045 = vst.msk [vmem:[%s5427_s4 + $0x30] sm:$0xf] %vm3032_vm3, %v2980_v37  ;;  %v2107_v45 = vmax.f32 %v2043_v38, 0.0  ;;  %3700 = vmatmul.msk.bf16.gmra.mxu2 %vm259_vm2, %v4022_v33  ;;  %3924 = vmatmul.msk.bf16.gmra.mxu3 %vm259_vm2, %v4054_v34  ;;  %v2853_v47 = vmax.f32 %v2789_v39, 0.0 }
  0xff   :  { %v680_v48 = vmax.f32 %v616_v42, 0.0  ;;  %v1362_v49 = vmax.f32 %v1298_v43, 0.0 }
 0x100   :  { %v2171_v46 = vmax.f32 %v1425_v44, %v2107_v45 }
 0x101   :  { %v1841_v50 = vpop.f32.mrf.mxu2  ;;  %v2587_v51 = vpop.f32.mrf.mxu3  ;;  %v1426_v60 = vmax.f32 %v680_v48, %v1362_v49 }
 0x102   :  { %v2917_v52 = vmax.f32 %v2171_v46, %v2853_v47  ;;  %v1980_v53 = vmul.f32 %v4244_v40, %v1841_v50  ;;  %v2726_v54 = vmul.f32 %v4244_v40, %v2587_v51  ;;  %v409_v55 = vpop.f32.mrf.mxu0  ;;  %v1097_v56 = vpop.f32.mrf.mxu1 }
 0x103   :  { %v550_v57 = vmul.f32 %v4244_v40, %v409_v55  ;;  %v1235_v58 = vmul.f32 %v4244_v40, %v1097_v56 }
 0x104   :  { %v2981_v59 = vpack.c.bf16 %v2917_v52, %v2917_v52  ;;  %v2044_v61 = vadd.f32 %v4249_v41, %v1980_v53  ;;  %v2790_v62 = vadd.f32 %v4249_v41, %v2726_v54  ;;  %v3960_v53 = vld [vmem:[%s5426_s0 + $0x88] sm:$0xff] }
 0x105   :  { %v617_v63 = vadd.f32 %v4249_v41, %v550_v57  ;;  %v1299_v2 = vadd.f32 %v4249_v41, %v1235_v58  ;;  %v3992_v54 = vld [vmem:[%s5426_s0 + $0x188] sm:$0xff] }
 0x106   :  { %3046 = vst.msk [vmem:[%s5427_s4 + $0x34] sm:$0xf] %vm3032_vm3, %v2981_v59  ;;  %v2108_v0 = vmax.f32 %v2044_v61, 0.0  ;;  %v2854_v1 = vmax.f32 %v2790_v62, 0.0  ;;  %v4024_v61 = vld [vmem:[%s5426_s0 + $0x288] sm:$0xff] }
 0x107   :  { %v681_v4 = vmax.f32 %v617_v63, 0.0  ;;  %v1363_v10 = vmax.f32 %v1299_v2, 0.0  ;;  %v4056_v62 = vld [vmem:[%s5426_s0 + $0x388] sm:$0xff] }
 0x108   :  { %v2172_v3 = vmax.f32 %v1426_v60, %v2108_v0 }
 0x109   :  { %v1843_v5 = vpop.f32.mrf.mxu2  ;;  %v2589_v6 = vpop.f32.mrf.mxu3  ;;  %v1427_v24 = vmax.f32 %v681_v4, %v1363_v10 }
 0x10a   :  { %v2918_v9 = vmax.f32 %v2172_v3, %v2854_v1  ;;  %v1981_v11 = vmul.f32 %v4244_v40, %v1843_v5  ;;  %v2727_v12 = vmul.f32 %v4244_v40, %v2589_v6  ;;  %v412_v13 = vpop.f32.mrf.mxu0  ;;  %v1100_v14 = vpop.f32.mrf.mxu1 }
 0x10b   :  { %v551_v17 = vmul.f32 %v4244_v40, %v412_v13  ;;  %v1236_v18 = vmul.f32 %v4244_v40, %v1100_v14 }
 0x10c   :  { %v2982_v19 = vpack.c.bf16 %v2918_v9, %v2918_v9  ;;  %v2045_v20 = vadd.f32 %v4249_v41, %v1981_v11  ;;  %v2791_v21 = vadd.f32 %v4249_v41, %v2727_v12 }
 0x10d   :  { %v618_v22 = vadd.f32 %v4249_v41, %v551_v17  ;;  %v1300_v23 = vadd.f32 %v4249_v41, %v1236_v18  ;;  %3253 = vmatmul.msk.bf16.gmra.mxu0 %vm259_vm2, %v3959_v7  ;;  %3477 = vmatmul.msk.bf16.gmra.mxu1 %vm259_vm2, %v3991_v8 }
 0x10e   :  { %3047 = vst.msk [vmem:[%s5427_s4 + $0x38] sm:$0xf] %vm3032_vm3, %v2982_v19  ;;  %v2109_v25 = vmax.f32 %v2045_v20, 0.0  ;;  %3701 = vmatmul.msk.bf16.gmra.mxu2 %vm259_vm2, %v4023_v15  ;;  %3925 = vmatmul.msk.bf16.gmra.mxu3 %vm259_vm2, %v4055_v16  ;;  %v2855_v27 = vmax.f32 %v2791_v21, 0.0 }
 0x10f   :  { %v682_v28 = vmax.f32 %v618_v22, 0.0  ;;  %v1364_v29 = vmax.f32 %v1300_v23, 0.0 }
 0x110   :  { %v2173_v26 = vmax.f32 %v1427_v24, %v2109_v25 }
 0x111   :  { %v1846_v30 = vpop.f32.mrf.mxu2  ;;  %v2592_v31 = vpop.f32.mrf.mxu3  ;;  %v1428_v42 = vmax.f32 %v682_v28, %v1364_v29 }
 0x112   :  { %v2919_v32 = vmax.f32 %v2173_v26, %v2855_v27  ;;  %v1982_v33 = vmul.f32 %v4244_v40, %v1846_v30  ;;  %v2728_v34 = vmul.f32 %v4244_v40, %v2592_v31  ;;  %v414_v35 = vpop.f32.mrf.mxu0  ;;  %v1102_v36 = vpop.f32.mrf.mxu1 }
 0x113   :  { %v552_v37 = vmul.f32 %v4244_v40, %v414_v35  ;;  %v1237_v38 = vmul.f32 %v4244_v40, %v1102_v36 }
 0x114   :  { %v2983_v39 = vpack.c.bf16 %v2919_v32, %v2919_v32  ;;  %v2046_v43 = vadd.f32 %v4249_v41, %v1982_v33  ;;  %v2792_v44 = vadd.f32 %v4249_v41, %v2728_v34  ;;  %v3961_v33 = vld [vmem:[%s5426_s0 + $0x90] sm:$0xff] }
 0x115   :  { %v619_v45 = vadd.f32 %v4249_v41, %v552_v37  ;;  %v1301_v48 = vadd.f32 %v4249_v41, %v1237_v38  ;;  %v3993_v34 = vld [vmem:[%s5426_s0 + $0x190] sm:$0xff] }
 0x116   :  { %3048 = vst.msk [vmem:[%s5427_s4 + $0x3c] sm:$0xf] %vm3032_vm3, %v2983_v39  ;;  %v2110_v46 = vmax.f32 %v2046_v43, 0.0  ;;  %v2856_v47 = vmax.f32 %v2792_v44, 0.0  ;;  %v4025_v43 = vld [vmem:[%s5426_s0 + $0x290] sm:$0xff] }
 0x117   :  { %v683_v50 = vmax.f32 %v619_v45, 0.0  ;;  %v1365_v56 = vmax.f32 %v1301_v48, 0.0  ;;  %v4057_v44 = vld [vmem:[%s5426_s0 + $0x390] sm:$0xff] }
 0x118   :  { %v2174_v49 = vmax.f32 %v1428_v42, %v2110_v46 }
 0x119   :  { %v1848_v51 = vpop.f32.mrf.mxu2  ;;  %v2594_v52 = vpop.f32.mrf.mxu3  ;;  %v1429_v6 = vmax.f32 %v683_v50, %v1365_v56 }
 0x11a   :  { %v2920_v55 = vmax.f32 %v2174_v49, %v2856_v47  ;;  %v1983_v57 = vmul.f32 %v4244_v40, %v1848_v51  ;;  %v2729_v58 = vmul.f32 %v4244_v40, %v2594_v52  ;;  %v417_v59 = vpop.f32.mrf.mxu0  ;;  %v1105_v60 = vpop.f32.mrf.mxu1 }
 0x11b   :  { %v553_v63 = vmul.f32 %v4244_v40, %v417_v59  ;;  %v1238_v0 = vmul.f32 %v4244_v40, %v1105_v60  ;;  %v4670_v59 = vld [vmem:[%s5424_s2] ss:$0 sm:$0xff] }
 0x11c   :  { %v2984_v1 = vpack.c.bf16 %v2920_v55, %v2920_v55  ;;  %v2047_v2 = vadd.f32 %v4249_v41, %v1983_v57  ;;  %v2793_v3 = vadd.f32 %v4249_v41, %v2729_v58 }
 0x11d   :  { %v620_v4 = vadd.f32 %v4249_v41, %v553_v63  ;;  %v1302_v5 = vadd.f32 %v4249_v41, %v1238_v0  ;;  %3254 = vmatmul.msk.bf16.gmra.mxu0 %vm259_vm2, %v3960_v53  ;;  %3478 = vmatmul.msk.bf16.gmra.mxu1 %vm259_vm2, %v3992_v54 }
 0x11e   :  { %3049 = vst.msk [vmem:[%s5427_s4 + $0x40] sm:$0xf] %vm3032_vm3, %v2984_v1  ;;  %v2111_v7 = vmax.f32 %v2047_v2, 0.0  ;;  %3702 = vmatmul.msk.bf16.gmra.mxu2 %vm259_vm2, %v4024_v61  ;;  %3926 = vmatmul.msk.bf16.gmra.mxu3 %vm259_vm2, %v4056_v62  ;;  %v2857_v9 = vmax.f32 %v2793_v3, 0.0 }
 0x11f   :  { %v684_v10 = vmax.f32 %v620_v4, 0.0  ;;  %v1366_v11 = vmax.f32 %v1302_v5, 0.0  ;;  %v4679_v4 = vld [vmem:[%s5425_s3] ss:$0 sm:$0xff] }
 0x120   :  { %v2175_v8 = vmax.f32 %v1429_v6, %v2111_v7 }
 0x121   :  { %v1851_v12 = vpop.f32.mrf.mxu2  ;;  %v2597_v13 = vpop.f32.mrf.mxu3  ;;  %v1430_v22 = vmax.f32 %v684_v10, %v1366_v11 }
 0x122   :  { %v2921_v14 = vmax.f32 %v2175_v8, %v2857_v9  ;;  %v1984_v15 = vmul.f32 %v4244_v40, %v1851_v12  ;;  %v2730_v16 = vmul.f32 %v4244_v40, %v2597_v13  ;;  %v419_v17 = vpop.f32.mrf.mxu0  ;;  %v1107_v18 = vpop.f32.mrf.mxu1 }
 0x123   :  { %v554_v19 = vmul.f32 %v4244_v40, %v419_v17  ;;  %v1239_v20 = vmul.f32 %v4244_v40, %v1107_v18 }
 0x124   :  { %v2985_v21 = vpack.c.bf16 %v2921_v14, %v2921_v14  ;;  %v2048_v23 = vadd.f32 %v4249_v41, %v1984_v15  ;;  %v2794_v24 = vadd.f32 %v4249_v41, %v2730_v16  ;;  %v3962_v15 = vld [vmem:[%s5426_s0 + $0x98] sm:$0xff] }
 0x125   :  { %v621_v25 = vadd.f32 %v4249_v41, %v554_v19  ;;  %v1303_v28 = vadd.f32 %v4249_v41, %v1239_v20  ;;  %v3994_v16 = vld [vmem:[%s5426_s0 + $0x198] sm:$0xff] }
 0x126   :  { %3050 = vst.msk [vmem:[%s5427_s4 + $0x44] sm:$0xf] %vm3032_vm3, %v2985_v21  ;;  %v2112_v26 = vmax.f32 %v2048_v23, 0.0  ;;  %v2858_v27 = vmax.f32 %v2794_v24, 0.0  ;;  %v4026_v23 = vld [vmem:[%s5426_s0 + $0x298] sm:$0xff] }
 0x127   :  { %v685_v30 = vmax.f32 %v621_v25, 0.0  ;;  %v1367_v36 = vmax.f32 %v1303_v28, 0.0  ;;  %v4058_v24 = vld [vmem:[%s5426_s0 + $0x398] sm:$0xff] }
 0x128   :  { %v2176_v29 = vmax.f32 %v1430_v22, %v2112_v26 }
 0x129   :  { %v1853_v31 = vpop.f32.mrf.mxu2  ;;  %v2599_v32 = vpop.f32.mrf.mxu3  ;;  %v1431_v52 = vmax.f32 %v685_v30, %v1367_v36 }
 0x12a   :  { %v2922_v35 = vmax.f32 %v2176_v29, %v2858_v27  ;;  %v1985_v37 = vmul.f32 %v4244_v40, %v1853_v31  ;;  %v2731_v38 = vmul.f32 %v4244_v40, %v2599_v32  ;;  %v422_v39 = vpop.f32.mrf.mxu0  ;;  %v1110_v42 = vpop.f32.mrf.mxu1 }
 0x12b   :  { %v555_v45 = vmul.f32 %v4244_v40, %v422_v39  ;;  %v1240_v46 = vmul.f32 %v4244_v40, %v1110_v42 }
 0x12c   :  { %v2986_v47 = vpack.c.bf16 %v2922_v35, %v2922_v35  ;;  %v2049_v48 = vadd.f32 %v4249_v41, %v1985_v37  ;;  %v2795_v49 = vadd.f32 %v4249_v41, %v2731_v38 }
 0x12d   :  { %v622_v50 = vadd.f32 %v4249_v41, %v555_v45  ;;  %v1304_v51 = vadd.f32 %v4249_v41, %v1240_v46  ;;  %3255 = vmatmul.msk.bf16.gmra.mxu0 %vm259_vm2, %v3961_v33  ;;  %3479 = vmatmul.msk.bf16.gmra.mxu1 %vm259_vm2, %v3993_v34 }
 0x12e   :  { %3051 = vst.msk [vmem:[%s5427_s4 + $0x48] sm:$0xf] %vm3032_vm3, %v2986_v47  ;;  %v2113_v40 = vmax.f32 %v2049_v48, 0.0  ;;  %3703 = vmatmul.msk.bf16.gmra.mxu2 %vm259_vm2, %v4025_v43  ;;  %3927 = vmatmul.msk.bf16.gmra.mxu3 %vm259_vm2, %v4057_v44  ;;  %v2859_v54 = vmax.f32 %v2795_v49, 0.0 }
 0x12f   :  { %v686_v55 = vmax.f32 %v622_v50, 0.0  ;;  %v1368_v56 = vmax.f32 %v1304_v51, 0.0 }
 0x130   :  { %v2177_v53 = vmax.f32 %v1431_v52, %v2113_v40 }
 0x131   :  { %v1856_v41 = vpop.f32.mrf.mxu2  ;;  %v2602_v57 = vpop.f32.mrf.mxu3  ;;  %v1432_v3 = vmax.f32 %v686_v55, %v1368_v56 }
 0x132   :  { %v2923_v58 = vmax.f32 %v2177_v53, %v2859_v54  ;;  %v1986_v60 = vmul.f32 %v4670_v59, %v1856_v41  ;;  %v2732_v61 = vmul.f32 %v4670_v59, %v2602_v57  ;;  %v424_v62 = vpop.f32.mrf.mxu0  ;;  %v1112_v63 = vpop.f32.mrf.mxu1 }
 0x133   :  { %v556_v0 = vmul.f32 %v4670_v59, %v424_v62  ;;  %v1241_v1 = vmul.f32 %v4670_v59, %v1112_v63 }
 0x134   :  { %v2987_v2 = vpack.c.bf16 %v2923_v58, %v2923_v58  ;;  %v2050_v5 = vadd.f32 %v4679_v4, %v1986_v60  ;;  %v2796_v6 = vadd.f32 %v4679_v4, %v2732_v61  ;;  %v3963_v60 = vld [vmem:[%s5426_s0 + $0xa0] sm:$0xff] }
 0x135   :  { %v623_v7 = vadd.f32 %v4679_v4, %v556_v0  ;;  %v1305_v10 = vadd.f32 %v4679_v4, %v1241_v1  ;;  %v3995_v61 = vld [vmem:[%s5426_s0 + $0x1a0] sm:$0xff] }
 0x136   :  { %3052 = vst.msk [vmem:[%s5427_s4 + $0x4c] sm:$0xf] %vm3032_vm3, %v2987_v2  ;;  %v2114_v8 = vmax.f32 %v2050_v5, 0.0  ;;  %v2860_v9 = vmax.f32 %v2796_v6, 0.0  ;;  %v4027_v5 = vld [vmem:[%s5426_s0 + $0x2a0] sm:$0xff] }
 0x137   :  { %v687_v12 = vmax.f32 %v623_v7, 0.0  ;;  %v1369_v18 = vmax.f32 %v1305_v10, 0.0  ;;  %v4059_v6 = vld [vmem:[%s5426_s0 + $0x3a0] sm:$0xff] }
 0x138   :  { %v2178_v11 = vmax.f32 %v1432_v3, %v2114_v8 }
 0x139   :  { %v1858_v13 = vpop.f32.mrf.mxu2  ;;  %v2604_v14 = vpop.f32.mrf.mxu3  ;;  %v1433_v32 = vmax.f32 %v687_v12, %v1369_v18 }
 0x13a   :  { %v2924_v17 = vmax.f32 %v2178_v11, %v2860_v9  ;;  %v1987_v19 = vmul.f32 %v4670_v59, %v1858_v13  ;;  %v2733_v20 = vmul.f32 %v4670_v59, %v2604_v14  ;;  %v427_v21 = vpop.f32.mrf.mxu0  ;;  %v1115_v22 = vpop.f32.mrf.mxu1 }
 0x13b   :  { %v557_v25 = vmul.f32 %v4670_v59, %v427_v21  ;;  %v1242_v26 = vmul.f32 %v4670_v59, %v1115_v22 }
 0x13c   :  { %v2988_v27 = vpack.c.bf16 %v2924_v17, %v2924_v17  ;;  %v2051_v28 = vadd.f32 %v4679_v4, %v1987_v19  ;;  %v2797_v29 = vadd.f32 %v4679_v4, %v2733_v20 }
 0x13d   :  { %v624_v30 = vadd.f32 %v4679_v4, %v557_v25  ;;  %v1306_v31 = vadd.f32 %v4679_v4, %v1242_v26  ;;  %3256 = vmatmul.msk.bf16.gmra.mxu0 %vm259_vm2, %v3962_v15  ;;  %3480 = vmatmul.msk.bf16.gmra.mxu1 %vm259_vm2, %v3994_v16 }
 0x13e   :  { %3053 = vst.msk [vmem:[%s5427_s4 + $0x50] sm:$0xf] %vm3032_vm3, %v2988_v27  ;;  %v2115_v33 = vmax.f32 %v2051_v28, 0.0  ;;  %3704 = vmatmul.msk.bf16.gmra.mxu2 %vm259_vm2, %v4026_v23  ;;  %3928 = vmatmul.msk.bf16.gmra.mxu3 %vm259_vm2, %v4058_v24  ;;  %v2861_v35 = vmax.f32 %v2797_v29, 0.0 }
 0x13f   :  { %v688_v36 = vmax.f32 %v624_v30, 0.0  ;;  %v1370_v37 = vmax.f32 %v1306_v31, 0.0 }
 0x140   :  { %v2179_v34 = vmax.f32 %v1433_v32, %v2115_v33 }
 0x141   :  { %v1861_v38 = vpop.f32.mrf.mxu2  ;;  %v2607_v39 = vpop.f32.mrf.mxu3  ;;  %v1434_v50 = vmax.f32 %v688_v36, %v1370_v37 }
 0x142   :  { %v2925_v42 = vmax.f32 %v2179_v34, %v2861_v35  ;;  %v1988_v43 = vmul.f32 %v4670_v59, %v1861_v38  ;;  %v2734_v44 = vmul.f32 %v4670_v59, %v2607_v39  ;;  %v429_v45 = vpop.f32.mrf.mxu0  ;;  %v1117_v46 = vpop.f32.mrf.mxu1 }
 0x143   :  { %v558_v47 = vmul.f32 %v4670_v59, %v429_v45  ;;  %v1243_v48 = vmul.f32 %v4670_v59, %v1117_v46 }
 0x144   :  { %v2989_v49 = vpack.c.bf16 %v2925_v42, %v2925_v42  ;;  %v2052_v51 = vadd.f32 %v4679_v4, %v1988_v43  ;;  %v2798_v52 = vadd.f32 %v4679_v4, %v2734_v44  ;;  %v3964_v43 = vld [vmem:[%s5426_s0 + $0xa8] sm:$0xff] }
 0x145   :  { %v625_v40 = vadd.f32 %v4679_v4, %v558_v47  ;;  %v1307_v55 = vadd.f32 %v4679_v4, %v1243_v48  ;;  %v3996_v44 = vld [vmem:[%s5426_s0 + $0x1a8] sm:$0xff] }
 0x146   :  { %3054 = vst.msk [vmem:[%s5427_s4 + $0x54] sm:$0xf] %vm3032_vm3, %v2989_v49  ;;  %v2116_v53 = vmax.f32 %v2052_v51, 0.0  ;;  %v2862_v54 = vmax.f32 %v2798_v52, 0.0  ;;  %v4028_v51 = vld [vmem:[%s5426_s0 + $0x2a8] sm:$0xff] }
 0x147   :  { %v689_v41 = vmax.f32 %v625_v40, 0.0  ;;  %v1371_v63 = vmax.f32 %v1307_v55, 0.0  ;;  %v4060_v52 = vld [vmem:[%s5426_s0 + $0x3a8] sm:$0xff] }
 0x148   :  { %v2180_v56 = vmax.f32 %v1434_v50, %v2116_v53 }
 0x149   :  { %v1863_v57 = vpop.f32.mrf.mxu2  ;;  %v2609_v58 = vpop.f32.mrf.mxu3  ;;  %v1435_v14 = vmax.f32 %v689_v41, %v1371_v63 }
 0x14a   :  { %v2926_v62 = vmax.f32 %v2180_v56, %v2862_v54  ;;  %v1989_v0 = vmul.f32 %v4670_v59, %v1863_v57  ;;  %v2735_v1 = vmul.f32 %v4670_v59, %v2609_v58  ;;  %v432_v2 = vpop.f32.mrf.mxu0  ;;  %v1120_v3 = vpop.f32.mrf.mxu1 }
 0x14b   :  { %v559_v7 = vmul.f32 %v4670_v59, %v432_v2  ;;  %v1244_v8 = vmul.f32 %v4670_v59, %v1120_v3 }
 0x14c   :  { %v2990_v9 = vpack.c.bf16 %v2926_v62, %v2926_v62  ;;  %v2053_v10 = vadd.f32 %v4679_v4, %v1989_v0  ;;  %v2799_v11 = vadd.f32 %v4679_v4, %v2735_v1 }
 0x14d   :  { %v626_v12 = vadd.f32 %v4679_v4, %v559_v7  ;;  %v1308_v13 = vadd.f32 %v4679_v4, %v1244_v8  ;;  %3257 = vmatmul.msk.bf16.gmra.mxu0 %vm259_vm2, %v3963_v60  ;;  %3481 = vmatmul.msk.bf16.gmra.mxu1 %vm259_vm2, %v3995_v61 }
 0x14e   :  { %3055 = vst.msk [vmem:[%s5427_s4 + $0x58] sm:$0xf] %vm3032_vm3, %v2990_v9  ;;  %v2117_v15 = vmax.f32 %v2053_v10, 0.0  ;;  %3705 = vmatmul.msk.bf16.gmra.mxu2 %vm259_vm2, %v4027_v5  ;;  %3929 = vmatmul.msk.bf16.gmra.mxu3 %vm259_vm2, %v4059_v6  ;;  %v2863_v17 = vmax.f32 %v2799_v11, 0.0 }
 0x14f   :  { %v690_v18 = vmax.f32 %v626_v12, 0.0  ;;  %v1372_v19 = vmax.f32 %v1308_v13, 0.0 }
 0x150   :  { %v2181_v16 = vmax.f32 %v1435_v14, %v2117_v15 }
 0x151   :  { %v1866_v20 = vpop.f32.mrf.mxu2  ;;  %v2612_v21 = vpop.f32.mrf.mxu3  ;;  %v1436_v30 = vmax.f32 %v690_v18, %v1372_v19 }
 0x152   :  { %v2927_v22 = vmax.f32 %v2181_v16, %v2863_v17  ;;  %v1990_v23 = vmul.f32 %v4670_v59, %v1866_v20  ;;  %v2736_v24 = vmul.f32 %v4670_v59, %v2612_v21  ;;  %v434_v25 = vpop.f32.mrf.mxu0  ;;  %v1122_v26 = vpop.f32.mrf.mxu1 }
 0x153   :  { %v560_v27 = vmul.f32 %v4670_v59, %v434_v25  ;;  %v1245_v28 = vmul.f32 %v4670_v59, %v1122_v26 }
 0x154   :  { %v2991_v29 = vpack.c.bf16 %v2927_v22, %v2927_v22  ;;  %v2054_v31 = vadd.f32 %v4679_v4, %v1990_v23  ;;  %v2800_v32 = vadd.f32 %v4679_v4, %v2736_v24  ;;  %v3965_v23 = vld [vmem:[%s5426_s0 + $0xb0] sm:$0xff] }
 0x155   :  { %v627_v33 = vadd.f32 %v4679_v4, %v560_v27  ;;  %v1309_v36 = vadd.f32 %v4679_v4, %v1245_v28  ;;  %v3997_v24 = vld [vmem:[%s5426_s0 + $0x1b0] sm:$0xff] }
 0x156   :  { %3056 = vst.msk [vmem:[%s5427_s4 + $0x5c] sm:$0xf] %vm3032_vm3, %v2991_v29  ;;  %v2118_v34 = vmax.f32 %v2054_v31, 0.0  ;;  %v2864_v35 = vmax.f32 %v2800_v32, 0.0  ;;  %v4029_v31 = vld [vmem:[%s5426_s0 + $0x2b0] sm:$0xff] }
 0x157   :  { %v691_v38 = vmax.f32 %v627_v33, 0.0  ;;  %v1373_v46 = vmax.f32 %v1309_v36, 0.0  ;;  %v4061_v32 = vld [vmem:[%s5426_s0 + $0x3b0] sm:$0xff] }
 0x158   :  { %v2182_v37 = vmax.f32 %v1436_v30, %v2118_v34 }
 0x159   :  { %v1868_v39 = vpop.f32.mrf.mxu2  ;;  %v2614_v42 = vpop.f32.mrf.mxu3  ;;  %v1437_v58 = vmax.f32 %v691_v38, %v1373_v46 }
 0x15a   :  { %v2928_v45 = vmax.f32 %v2182_v37, %v2864_v35  ;;  %v1991_v47 = vmul.f32 %v4670_v59, %v1868_v39  ;;  %v2737_v48 = vmul.f32 %v4670_v59, %v2614_v42  ;;  %v437_v49 = vpop.f32.mrf.mxu0  ;;  %v1125_v50 = vpop.f32.mrf.mxu1 }
 0x15b   :  { %v561_v40 = vmul.f32 %v4670_v59, %v437_v49  ;;  %v1246_v53 = vmul.f32 %v4670_v59, %v1125_v50 }
 0x15c   :  { %v2992_v54 = vpack.c.bf16 %v2928_v45, %v2928_v45  ;;  %v2055_v55 = vadd.f32 %v4679_v4, %v1991_v47  ;;  %v2801_v56 = vadd.f32 %v4679_v4, %v2737_v48 }
 0x15d   :  { %v628_v41 = vadd.f32 %v4679_v4, %v561_v40  ;;  %v1310_v57 = vadd.f32 %v4679_v4, %v1246_v53  ;;  %3258 = vmatmul.msk.bf16.gmra.mxu0 %vm259_vm2, %v3964_v43  ;;  %3482 = vmatmul.msk.bf16.gmra.mxu1 %vm259_vm2, %v3996_v44 }
 0x15e   :  { %3057 = vst.msk [vmem:[%s5427_s4 + $0x60] sm:$0xf] %vm3032_vm3, %v2992_v54  ;;  %v2119_v60 = vmax.f32 %v2055_v55, 0.0  ;;  %3706 = vmatmul.msk.bf16.gmra.mxu2 %vm259_vm2, %v4028_v51  ;;  %3930 = vmatmul.msk.bf16.gmra.mxu3 %vm259_vm2, %v4060_v52  ;;  %v2865_v62 = vmax.f32 %v2801_v56, 0.0 }
 0x15f   :  { %v692_v63 = vmax.f32 %v628_v41, 0.0  ;;  %v1374_v0 = vmax.f32 %v1310_v57, 0.0 }
 0x160   :  { %v2183_v61 = vmax.f32 %v1437_v58, %v2119_v60 }
 0x161   :  { %v1871_v1 = vpop.f32.mrf.mxu2  ;;  %v2617_v2 = vpop.f32.mrf.mxu3  ;;  %v1438_v12 = vmax.f32 %v692_v63, %v1374_v0 }
 0x162   :  { %v2929_v3 = vmax.f32 %v2183_v61, %v2865_v62  ;;  %v1992_v5 = vmul.f32 %v4670_v59, %v1871_v1  ;;  %v2738_v6 = vmul.f32 %v4670_v59, %v2617_v2  ;;  %v439_v7 = vpop.f32.mrf.mxu0  ;;  %v1127_v8 = vpop.f32.mrf.mxu1 }
 0x163   :  { %v562_v9 = vmul.f32 %v4670_v59, %v439_v7  ;;  %v1247_v10 = vmul.f32 %v4670_v59, %v1127_v8 }
 0x164   :  { %v2993_v11 = vpack.c.bf16 %v2929_v3, %v2929_v3  ;;  %v2056_v13 = vadd.f32 %v4679_v4, %v1992_v5  ;;  %v2802_v14 = vadd.f32 %v4679_v4, %v2738_v6  ;;  %v3966_v5 = vld [vmem:[%s5426_s0 + $0xb8] sm:$0xff] }
 0x165   :  { %v629_v15 = vadd.f32 %v4679_v4, %v562_v9  ;;  %v1311_v18 = vadd.f32 %v4679_v4, %v1247_v10  ;;  %v3998_v6 = vld [vmem:[%s5426_s0 + $0x1b8] sm:$0xff] }
 0x166   :  { %3058 = vst.msk [vmem:[%s5427_s4 + $0x64] sm:$0xf] %vm3032_vm3, %v2993_v11  ;;  %v2120_v16 = vmax.f32 %v2056_v13, 0.0  ;;  %v2866_v17 = vmax.f32 %v2802_v14, 0.0  ;;  %v4030_v13 = vld [vmem:[%s5426_s0 + $0x2b8] sm:$0xff] }
 0x167   :  { %v693_v20 = vmax.f32 %v629_v15, 0.0  ;;  %v1375_v26 = vmax.f32 %v1311_v18, 0.0  ;;  %v4062_v14 = vld [vmem:[%s5426_s0 + $0x3b8] sm:$0xff] }
 0x168   :  { %v2184_v19 = vmax.f32 %v1438_v12, %v2120_v16 }
 0x169   :  { %v1873_v21 = vpop.f32.mrf.mxu2  ;;  %v2619_v22 = vpop.f32.mrf.mxu3  ;;  %v1439_v42 = vmax.f32 %v693_v20, %v1375_v26 }
 0x16a   :  { %v2930_v25 = vmax.f32 %v2184_v19, %v2866_v17  ;;  %v1993_v27 = vmul.f32 %v4670_v59, %v1873_v21  ;;  %v2739_v28 = vmul.f32 %v4670_v59, %v2619_v22  ;;  %v442_v29 = vpop.f32.mrf.mxu0  ;;  %v1130_v30 = vpop.f32.mrf.mxu1 }
 0x16b   :  { %v563_v33 = vmul.f32 %v4670_v59, %v442_v29  ;;  %v1248_v34 = vmul.f32 %v4670_v59, %v1130_v30 }
 0x16c   :  { %v2994_v35 = vpack.c.bf16 %v2930_v25, %v2930_v25  ;;  %v2057_v36 = vadd.f32 %v4679_v4, %v1993_v27  ;;  %v2803_v37 = vadd.f32 %v4679_v4, %v2739_v28 }
 0x16d   :  { %v630_v38 = vadd.f32 %v4679_v4, %v563_v33  ;;  %v1312_v39 = vadd.f32 %v4679_v4, %v1248_v34  ;;  %3259 = vmatmul.msk.bf16.gmra.mxu0 %vm259_vm2, %v3965_v23  ;;  %3483 = vmatmul.msk.bf16.gmra.mxu1 %vm259_vm2, %v3997_v24 }
 0x16e   :  { %3059 = vst.msk [vmem:[%s5427_s4 + $0x68] sm:$0xf] %vm3032_vm3, %v2994_v35  ;;  %v2121_v43 = vmax.f32 %v2057_v36, 0.0  ;;  %3707 = vmatmul.msk.bf16.gmra.mxu2 %vm259_vm2, %v4029_v31  ;;  %3931 = vmatmul.msk.bf16.gmra.mxu3 %vm259_vm2, %v4061_v32  ;;  %v2867_v45 = vmax.f32 %v2803_v37, 0.0 }
 0x16f   :  { %v694_v46 = vmax.f32 %v630_v38, 0.0  ;;  %v1376_v47 = vmax.f32 %v1312_v39, 0.0 }
 0x170   :  { %v2185_v44 = vmax.f32 %v1439_v42, %v2121_v43 }
 0x171   :  { %v1876_v48 = vpop.f32.mrf.mxu2  ;;  %v2622_v49 = vpop.f32.mrf.mxu3  ;;  %v1440_v41 = vmax.f32 %v694_v46, %v1376_v47 }
 0x172   :  { %v2931_v50 = vmax.f32 %v2185_v44, %v2867_v45  ;;  %v1994_v51 = vmul.f32 %v4670_v59, %v1876_v48  ;;  %v2740_v52 = vmul.f32 %v4670_v59, %v2622_v49  ;;  %v444_v40 = vpop.f32.mrf.mxu0  ;;  %v1132_v53 = vpop.f32.mrf.mxu1 }
 0x173   :  { %v564_v54 = vmul.f32 %v4670_v59, %v444_v40  ;;  %v1249_v55 = vmul.f32 %v4670_v59, %v1132_v53 }
 0x174   :  { %v2995_v56 = vpack.c.bf16 %v2931_v50, %v2931_v50  ;;  %v2058_v57 = vadd.f32 %v4679_v4, %v1994_v51  ;;  %v2804_v58 = vadd.f32 %v4679_v4, %v2740_v52  ;;  %v3967_v51 = vld [vmem:[%s5426_s0 + $0xc0] sm:$0xff] }
 0x175   :  { %v631_v60 = vadd.f32 %v4679_v4, %v564_v54  ;;  %v1313_v63 = vadd.f32 %v4679_v4, %v1249_v55  ;;  %v3999_v52 = vld [vmem:[%s5426_s0 + $0x1c0] sm:$0xff] }
 0x176   :  { %3060 = vst.msk [vmem:[%s5427_s4 + $0x6c] sm:$0xf] %vm3032_vm3, %v2995_v56  ;;  %v2122_v61 = vmax.f32 %v2058_v57, 0.0  ;;  %v2868_v62 = vmax.f32 %v2804_v58, 0.0  ;;  %v4031_v57 = vld [vmem:[%s5426_s0 + $0x2c0] sm:$0xff] }
 0x177   :  { %v695_v1 = vmax.f32 %v631_v60, 0.0  ;;  %v1377_v8 = vmax.f32 %v1313_v63, 0.0  ;;  %v4063_v58 = vld [vmem:[%s5426_s0 + $0x3c0] sm:$0xff] }
 0x178   :  { %v2186_v0 = vmax.f32 %v1440_v41, %v2122_v61 }
 0x179   :  { %v1878_v2 = vpop.f32.mrf.mxu2  ;;  %v2624_v3 = vpop.f32.mrf.mxu3  ;;  %v1441_v22 = vmax.f32 %v695_v1, %v1377_v8 }
 0x17a   :  { %v2932_v7 = vmax.f32 %v2186_v0, %v2868_v62  ;;  %v1995_v9 = vmul.f32 %v4670_v59, %v1878_v2  ;;  %v2741_v10 = vmul.f32 %v4670_v59, %v2624_v3  ;;  %v447_v11 = vpop.f32.mrf.mxu0  ;;  %v1135_v12 = vpop.f32.mrf.mxu1 }
 0x17b   :  { %v565_v15 = vmul.f32 %v4670_v59, %v447_v11  ;;  %v1250_v16 = vmul.f32 %v4670_v59, %v1135_v12 }
 0x17c   :  { %v2996_v17 = vpack.c.bf16 %v2932_v7, %v2932_v7  ;;  %v2059_v18 = vadd.f32 %v4679_v4, %v1995_v9  ;;  %v2805_v19 = vadd.f32 %v4679_v4, %v2741_v10 }
 0x17d   :  { %v632_v20 = vadd.f32 %v4679_v4, %v565_v15  ;;  %v1314_v21 = vadd.f32 %v4679_v4, %v1250_v16  ;;  %3260 = vmatmul.msk.bf16.gmra.mxu0 %vm259_vm2, %v3966_v5  ;;  %3484 = vmatmul.msk.bf16.gmra.mxu1 %vm259_vm2, %v3998_v6 }
 0x17e   :  { %3061 = vst.msk [vmem:[%s5427_s4 + $0x70] sm:$0xf] %vm3032_vm3, %v2996_v17  ;;  %v2123_v23 = vmax.f32 %v2059_v18, 0.0  ;;  %3708 = vmatmul.msk.bf16.gmra.mxu2 %vm259_vm2, %v4030_v13  ;;  %3932 = vmatmul.msk.bf16.gmra.mxu3 %vm259_vm2, %v4062_v14  ;;  %v2869_v25 = vmax.f32 %v2805_v19, 0.0 }
 0x17f   :  { %v696_v26 = vmax.f32 %v632_v20, 0.0  ;;  %v1378_v27 = vmax.f32 %v1314_v21, 0.0 }
 0x180   :  { %v2187_v24 = vmax.f32 %v1441_v22, %v2123_v23 }
 0x181   :  { %v1881_v28 = vpop.f32.mrf.mxu2  ;;  %v2627_v29 = vpop.f32.mrf.mxu3  ;;  %v1442_v38 = vmax.f32 %v696_v26, %v1378_v27 }
 0x182   :  { %v2933_v30 = vmax.f32 %v2187_v24, %v2869_v25  ;;  %v1996_v31 = vmul.f32 %v4670_v59, %v1881_v28  ;;  %v2742_v32 = vmul.f32 %v4670_v59, %v2627_v29  ;;  %v449_v33 = vpop.f32.mrf.mxu0  ;;  %v1137_v34 = vpop.f32.mrf.mxu1 }
 0x183   :  { %v566_v35 = vmul.f32 %v4670_v59, %v449_v33  ;;  %v1251_v36 = vmul.f32 %v4670_v59, %v1137_v34 }
 0x184   :  { %v2997_v37 = vpack.c.bf16 %v2933_v30, %v2933_v30  ;;  %v2060_v39 = vadd.f32 %v4679_v4, %v1996_v31  ;;  %v2806_v42 = vadd.f32 %v4679_v4, %v2742_v32  ;;  %v3968_v31 = vld [vmem:[%s5426_s0 + $0xc8] sm:$0xff] }
 0x185   :  { %v633_v43 = vadd.f32 %v4679_v4, %v566_v35  ;;  %v1315_v46 = vadd.f32 %v4679_v4, %v1251_v36  ;;  %v4000_v32 = vld [vmem:[%s5426_s0 + $0x1c8] sm:$0xff] }
 0x186   :  { %3062 = vst.msk [vmem:[%s5427_s4 + $0x74] sm:$0xf] %vm3032_vm3, %v2997_v37  ;;  %v2124_v44 = vmax.f32 %v2060_v39, 0.0  ;;  %v2870_v45 = vmax.f32 %v2806_v42, 0.0  ;;  %v4032_v39 = vld [vmem:[%s5426_s0 + $0x2c8] sm:$0xff] }
 0x187   :  { %v697_v48 = vmax.f32 %v633_v43, 0.0  ;;  %v1379_v53 = vmax.f32 %v1315_v46, 0.0  ;;  %v4064_v42 = vld [vmem:[%s5426_s0 + $0x3c8] sm:$0xff] }
 0x188   :  { %v2188_v47 = vmax.f32 %v1442_v38, %v2124_v44 }
 0x189   :  { %v1883_v49 = vpop.f32.mrf.mxu2  ;;  %v2629_v50 = vpop.f32.mrf.mxu3  ;;  %v1443_v3 = vmax.f32 %v697_v48, %v1379_v53 }
 0x18a   :  { %v2934_v40 = vmax.f32 %v2188_v47, %v2870_v45  ;;  %v1997_v54 = vmul.f32 %v4670_v59, %v1883_v49  ;;  %v2743_v55 = vmul.f32 %v4670_v59, %v2629_v50  ;;  %v452_v56 = vpop.f32.mrf.mxu0  ;;  %v1140_v41 = vpop.f32.mrf.mxu1 }
 0x18b   :  { %v567_v60 = vmul.f32 %v4670_v59, %v452_v56  ;;  %v1252_v61 = vmul.f32 %v4670_v59, %v1140_v41 }
 0x18c   :  { %v2998_v62 = vpack.c.bf16 %v2934_v40, %v2934_v40  ;;  %v2061_v63 = vadd.f32 %v4679_v4, %v1997_v54  ;;  %v2807_v0 = vadd.f32 %v4679_v4, %v2743_v55 }
 0x18d   :  { %v634_v1 = vadd.f32 %v4679_v4, %v567_v60  ;;  %v1316_v2 = vadd.f32 %v4679_v4, %v1252_v61  ;;  %3261 = vmatmul.msk.bf16.gmra.mxu0 %vm259_vm2, %v3967_v51  ;;  %3485 = vmatmul.msk.bf16.gmra.mxu1 %vm259_vm2, %v3999_v52 }
 0x18e   :  { %3063 = vst.msk [vmem:[%s5427_s4 + $0x78] sm:$0xf] %vm3032_vm3, %v2998_v62  ;;  %v2125_v5 = vmax.f32 %v2061_v63, 0.0  ;;  %3709 = vmatmul.msk.bf16.gmra.mxu2 %vm259_vm2, %v4031_v57  ;;  %3933 = vmatmul.msk.bf16.gmra.mxu3 %vm259_vm2, %v4063_v58  ;;  %v2871_v7 = vmax.f32 %v2807_v0, 0.0 }
 0x18f   :  { %v698_v8 = vmax.f32 %v634_v1, 0.0  ;;  %v1380_v9 = vmax.f32 %v1316_v2, 0.0 }
 0x190   :  { %v2189_v6 = vmax.f32 %v1443_v3, %v2125_v5 }
 0x191   :  { %v1886_v10 = vpop.f32.mrf.mxu2  ;;  %v2632_v11 = vpop.f32.mrf.mxu3  ;;  %v1444_v20 = vmax.f32 %v698_v8, %v1380_v9 }
 0x192   :  { %v2935_v12 = vmax.f32 %v2189_v6, %v2871_v7  ;;  %v1998_v13 = vmul.f32 %v4670_v59, %v1886_v10  ;;  %v2744_v14 = vmul.f32 %v4670_v59, %v2632_v11  ;;  %v454_v15 = vpop.f32.mrf.mxu0  ;;  %v1142_v16 = vpop.f32.mrf.mxu1 }
 0x193   :  { %v568_v17 = vmul.f32 %v4670_v59, %v454_v15  ;;  %v1253_v18 = vmul.f32 %v4670_v59, %v1142_v16 }
 0x194   :  { %v2999_v19 = vpack.c.bf16 %v2935_v12, %v2935_v12  ;;  %v2062_v21 = vadd.f32 %v4679_v4, %v1998_v13  ;;  %v2808_v22 = vadd.f32 %v4679_v4, %v2744_v14  ;;  %v3969_v13 = vld [vmem:[%s5426_s0 + $0xd0] sm:$0xff] }
 0x195   :  { %v635_v23 = vadd.f32 %v4679_v4, %v568_v17  ;;  %v1317_v26 = vadd.f32 %v4679_v4, %v1253_v18  ;;  %v4001_v14 = vld [vmem:[%s5426_s0 + $0x1d0] sm:$0xff] }
 0x196   :  { %3064 = vst.msk [vmem:[%s5427_s4 + $0x7c] sm:$0xf] %vm3032_vm3, %v2999_v19  ;;  %v2126_v24 = vmax.f32 %v2062_v21, 0.0  ;;  %v2872_v25 = vmax.f32 %v2808_v22, 0.0  ;;  %v4033_v21 = vld [vmem:[%s5426_s0 + $0x2d0] sm:$0xff] }
 0x197   :  { %v699_v28 = vmax.f32 %v635_v23, 0.0  ;;  %v1381_v34 = vmax.f32 %v1317_v26, 0.0  ;;  %v4065_v22 = vld [vmem:[%s5426_s0 + $0x3d0] sm:$0xff] }
 0x198   :  { %v2190_v27 = vmax.f32 %v1444_v20, %v2126_v24 }
 0x199   :  { %v1888_v29 = vpop.f32.mrf.mxu2  ;;  %v2634_v30 = vpop.f32.mrf.mxu3  ;;  %v1445_v50 = vmax.f32 %v699_v28, %v1381_v34 }
 0x19a   :  { %v2936_v33 = vmax.f32 %v2190_v27, %v2872_v25  ;;  %v1999_v35 = vmul.f32 %v4670_v59, %v1888_v29  ;;  %v2745_v36 = vmul.f32 %v4670_v59, %v2634_v30  ;;  %v457_v37 = vpop.f32.mrf.mxu0  ;;  %v1145_v38 = vpop.f32.mrf.mxu1 }
 0x19b   :  { %v569_v43 = vmul.f32 %v4670_v59, %v457_v37  ;;  %v1254_v44 = vmul.f32 %v4670_v59, %v1145_v38 }
 0x19c   :  { %v3000_v45 = vpack.c.bf16 %v2936_v33, %v2936_v33  ;;  %v2063_v46 = vadd.f32 %v4679_v4, %v1999_v35  ;;  %v2809_v47 = vadd.f32 %v4679_v4, %v2745_v36 }
 0x19d   :  { %v636_v48 = vadd.f32 %v4679_v4, %v569_v43  ;;  %v1318_v49 = vadd.f32 %v4679_v4, %v1254_v44  ;;  %3262 = vmatmul.msk.bf16.gmra.mxu0 %vm259_vm2, %v3968_v31  ;;  %3486 = vmatmul.msk.bf16.gmra.mxu1 %vm259_vm2, %v4000_v32 }
 0x19e   :  { %3065 = vst.msk [vmem:[%s5427_s4 + $0x80] sm:$0xf] %vm3032_vm3, %v3000_v45  ;;  %v2127_v51 = vmax.f32 %v2063_v46, 0.0  ;;  %3710 = vmatmul.msk.bf16.gmra.mxu2 %vm259_vm2, %v4032_v39  ;;  %3934 = vmatmul.msk.bf16.gmra.mxu3 %vm259_vm2, %v4064_v42  ;;  %v2873_v40 = vmax.f32 %v2809_v47, 0.0 }
 0x19f   :  { %v700_v53 = vmax.f32 %v636_v48, 0.0  ;;  %v1382_v54 = vmax.f32 %v1318_v49, 0.0 }
 0x1a0   :  { %v2191_v52 = vmax.f32 %v1445_v50, %v2127_v51 }
 0x1a1   :  { %v1891_v55 = vpop.f32.mrf.mxu2  ;;  %v2637_v56 = vpop.f32.mrf.mxu3  ;;  %v1446_v1 = vmax.f32 %v700_v53, %v1382_v54 }
 0x1a2   :  { %v2937_v41 = vmax.f32 %v2191_v52, %v2873_v40  ;;  %v2000_v57 = vmul.f32 %v4670_v59, %v1891_v55  ;;  %v2746_v58 = vmul.f32 %v4670_v59, %v2637_v56  ;;  %v459_v60 = vpop.f32.mrf.mxu0  ;;  %v1147_v61 = vpop.f32.mrf.mxu1 }
 0x1a3   :  { %v570_v62 = vmul.f32 %v4670_v59, %v459_v60  ;;  %v1255_v63 = vmul.f32 %v4670_v59, %v1147_v61 }
 0x1a4   :  { %v3001_v0 = vpack.c.bf16 %v2937_v41, %v2937_v41  ;;  %v2064_v2 = vadd.f32 %v4679_v4, %v2000_v57  ;;  %v2810_v3 = vadd.f32 %v4679_v4, %v2746_v58  ;;  %v3970_v57 = vld [vmem:[%s5426_s0 + $0xd8] sm:$0xff] }
 0x1a5   :  { %v637_v5 = vadd.f32 %v4679_v4, %v570_v62  ;;  %v1319_v8 = vadd.f32 %v4679_v4, %v1255_v63  ;;  %v4002_v58 = vld [vmem:[%s5426_s0 + $0x1d8] sm:$0xff] }
 0x1a6   :  { %3066 = vst.msk [vmem:[%s5427_s4 + $0x84] sm:$0xf] %vm3032_vm3, %v3001_v0  ;;  %v2128_v6 = vmax.f32 %v2064_v2, 0.0  ;;  %v2874_v7 = vmax.f32 %v2810_v3, 0.0  ;;  %v4034_v2 = vld [vmem:[%s5426_s0 + $0x2d8] sm:$0xff] }
 0x1a7   :  { %v701_v10 = vmax.f32 %v637_v5, 0.0  ;;  %v1383_v16 = vmax.f32 %v1319_v8, 0.0  ;;  %v4066_v3 = vld [vmem:[%s5426_s0 + $0x3d8] sm:$0xff] }
 0x1a8   :  { %v2192_v9 = vmax.f32 %v1446_v1, %v2128_v6 }
 0x1a9   :  { %v1893_v11 = vpop.f32.mrf.mxu2  ;;  %v2639_v12 = vpop.f32.mrf.mxu3  ;;  %v1447_v30 = vmax.f32 %v701_v10, %v1383_v16 }
 0x1aa   :  { %v2938_v15 = vmax.f32 %v2192_v9, %v2874_v7  ;;  %v2001_v17 = vmul.f32 %v4670_v59, %v1893_v11  ;;  %v2747_v18 = vmul.f32 %v4670_v59, %v2639_v12  ;;  %v462_v19 = vpop.f32.mrf.mxu0  ;;  %v1150_v20 = vpop.f32.mrf.mxu1 }
 0x1ab   :  { %v571_v23 = vmul.f32 %v4670_v59, %v462_v19  ;;  %v1256_v24 = vmul.f32 %v4670_v59, %v1150_v20 }
 0x1ac   :  { %v3002_v25 = vpack.c.bf16 %v2938_v15, %v2938_v15  ;;  %v2065_v26 = vadd.f32 %v4679_v4, %v2001_v17  ;;  %v2811_v27 = vadd.f32 %v4679_v4, %v2747_v18 }
 0x1ad   :  { %v638_v28 = vadd.f32 %v4679_v4, %v571_v23  ;;  %v1320_v29 = vadd.f32 %v4679_v4, %v1256_v24  ;;  %3263 = vmatmul.msk.bf16.gmra.mxu0 %vm259_vm2, %v3969_v13  ;;  %3487 = vmatmul.msk.bf16.gmra.mxu1 %vm259_vm2, %v4001_v14 }
 0x1ae   :  { %3067 = vst.msk [vmem:[%s5427_s4 + $0x88] sm:$0xf] %vm3032_vm3, %v3002_v25  ;;  %v2129_v31 = vmax.f32 %v2065_v26, 0.0  ;;  %3711 = vmatmul.msk.bf16.gmra.mxu2 %vm259_vm2, %v4033_v21  ;;  %3935 = vmatmul.msk.bf16.gmra.mxu3 %vm259_vm2, %v4065_v22  ;;  %v2875_v33 = vmax.f32 %v2811_v27, 0.0 }
 0x1af   :  { %v702_v34 = vmax.f32 %v638_v28, 0.0  ;;  %v1384_v35 = vmax.f32 %v1320_v29, 0.0 }
 0x1b0   :  { %v2193_v32 = vmax.f32 %v1447_v30, %v2129_v31 }
 0x1b1   :  { %v1896_v36 = vpop.f32.mrf.mxu2  ;;  %v2642_v37 = vpop.f32.mrf.mxu3  ;;  %v1448_v48 = vmax.f32 %v702_v34, %v1384_v35 }
 0x1b2   :  { %v2939_v38 = vmax.f32 %v2193_v32, %v2875_v33  ;;  %v2002_v39 = vmul.f32 %v4670_v59, %v1896_v36  ;;  %v2748_v42 = vmul.f32 %v4670_v59, %v2642_v37  ;;  %v464_v43 = vpop.f32.mrf.mxu0  ;;  %v1152_v44 = vpop.f32.mrf.mxu1 }
 0x1b3   :  { %v572_v45 = vmul.f32 %v4670_v59, %v464_v43  ;;  %v1257_v46 = vmul.f32 %v4670_v59, %v1152_v44 }
 0x1b4   :  { %v3003_v47 = vpack.c.bf16 %v2939_v38, %v2939_v38  ;;  %v2066_v49 = vadd.f32 %v4679_v4, %v2002_v39  ;;  %v2812_v50 = vadd.f32 %v4679_v4, %v2748_v42  ;;  %v3971_v39 = vld [vmem:[%s5426_s0 + $0xe0] sm:$0xff] }
 0x1b5   :  { %v639_v51 = vadd.f32 %v4679_v4, %v572_v45  ;;  %v1321_v53 = vadd.f32 %v4679_v4, %v1257_v46  ;;  %v4003_v42 = vld [vmem:[%s5426_s0 + $0x1e0] sm:$0xff] }
 0x1b6   :  { %3068 = vst.msk [vmem:[%s5427_s4 + $0x8c] sm:$0xf] %vm3032_vm3, %v3003_v47  ;;  %v2130_v52 = vmax.f32 %v2066_v49, 0.0  ;;  %v2876_v40 = vmax.f32 %v2812_v50, 0.0  ;;  %v4035_v49 = vld [vmem:[%s5426_s0 + $0x2e0] sm:$0xff] }
 0x1b7   :  { %v703_v55 = vmax.f32 %v639_v51, 0.0  ;;  %v1385_v61 = vmax.f32 %v1321_v53, 0.0  ;;  %v4067_v50 = vld [vmem:[%s5426_s0 + $0x3e0] sm:$0xff] }
 0x1b8   :  { %v2194_v54 = vmax.f32 %v1448_v48, %v2130_v52 }
 0x1b9   :  { %v1898_v56 = vpop.f32.mrf.mxu2  ;;  %v2644_v41 = vpop.f32.mrf.mxu3  ;;  %v1449_v12 = vmax.f32 %v703_v55, %v1385_v61 }
 0x1ba   :  { %v2940_v60 = vmax.f32 %v2194_v54, %v2876_v40  ;;  %v2003_v62 = vmul.f32 %v4670_v59, %v1898_v56  ;;  %v2749_v63 = vmul.f32 %v4670_v59, %v2644_v41  ;;  %v467_v0 = vpop.f32.mrf.mxu0  ;;  %v1155_v1 = vpop.f32.mrf.mxu1 }
 0x1bb   :  { %v573_v5 = vmul.f32 %v4670_v59, %v467_v0  ;;  %v1258_v6 = vmul.f32 %v4670_v59, %v1155_v1 }
 0x1bc   :  { %v3004_v7 = vpack.c.bf16 %v2940_v60, %v2940_v60  ;;  %v2067_v8 = vadd.f32 %v4679_v4, %v2003_v62  ;;  %v2813_v9 = vadd.f32 %v4679_v4, %v2749_v63 }
 0x1bd   :  { %v640_v10 = vadd.f32 %v4679_v4, %v573_v5  ;;  %v1322_v11 = vadd.f32 %v4679_v4, %v1258_v6  ;;  %3264 = vmatmul.msk.bf16.gmra.mxu0 %vm259_vm2, %v3970_v57  ;;  %3488 = vmatmul.msk.bf16.gmra.mxu1 %vm259_vm2, %v4002_v58 }
 0x1be   :  { %3069 = vst.msk [vmem:[%s5427_s4 + $0x90] sm:$0xf] %vm3032_vm3, %v3004_v7  ;;  %v2131_v13 = vmax.f32 %v2067_v8, 0.0  ;;  %3712 = vmatmul.msk.bf16.gmra.mxu2 %vm259_vm2, %v4034_v2  ;;  %3936 = vmatmul.msk.bf16.gmra.mxu3 %vm259_vm2, %v4066_v3  ;;  %v2877_v15 = vmax.f32 %v2813_v9, 0.0 }
 0x1bf   :  { %v704_v16 = vmax.f32 %v640_v10, 0.0  ;;  %v1386_v17 = vmax.f32 %v1322_v11, 0.0 }
 0x1c0   :  { %v2195_v14 = vmax.f32 %v1449_v12, %v2131_v13 }
 0x1c1   :  { %v1901_v18 = vpop.f32.mrf.mxu2  ;;  %v2647_v19 = vpop.f32.mrf.mxu3  ;;  %v1450_v28 = vmax.f32 %v704_v16, %v1386_v17 }
 0x1c2   :  { %v2941_v20 = vmax.f32 %v2195_v14, %v2877_v15  ;;  %v2004_v21 = vmul.f32 %v4670_v59, %v1901_v18  ;;  %v2750_v22 = vmul.f32 %v4670_v59, %v2647_v19  ;;  %v469_v23 = vpop.f32.mrf.mxu0  ;;  %v1157_v24 = vpop.f32.mrf.mxu1 }
 0x1c3   :  { %v574_v25 = vmul.f32 %v4670_v59, %v469_v23  ;;  %v1259_v26 = vmul.f32 %v4670_v59, %v1157_v24  ;;  %v5098_v24 = vld [vmem:[%s5424_s2] ss:$0 sm:$0xff] }
 0x1c4   :  { %v3005_v27 = vpack.c.bf16 %v2941_v20, %v2941_v20  ;;  %v2068_v29 = vadd.f32 %v4679_v4, %v2004_v21  ;;  %v2814_v30 = vadd.f32 %v4679_v4, %v2750_v22  ;;  %v3972_v20 = vld [vmem:[%s5426_s0 + $0xe8] sm:$0xff] }
 0x1c5   :  { %v641_v31 = vadd.f32 %v4679_v4, %v574_v25  ;;  %v1323_v34 = vadd.f32 %v4679_v4, %v1259_v26  ;;  %v4004_v21 = vld [vmem:[%s5426_s0 + $0x1e8] sm:$0xff] }
 0x1c6   :  { %3070 = vst.msk [vmem:[%s5427_s4 + $0x94] sm:$0xf] %vm3032_vm3, %v3005_v27  ;;  %v2132_v32 = vmax.f32 %v2068_v29, 0.0  ;;  %v2878_v33 = vmax.f32 %v2814_v30, 0.0  ;;  %v4068_v29 = vld [vmem:[%s5426_s0 + $0x3e8] sm:$0xff] }
 0x1c7   :  { %v705_v36 = vmax.f32 %v641_v31, 0.0  ;;  %v1387_v44 = vmax.f32 %v1323_v34, 0.0 }
 0x1c8   :  { %v2196_v35 = vmax.f32 %v1450_v28, %v2132_v32  ;;  %v4036_v28 = vld [vmem:[%s5426_s0 + $0x2e8] sm:$0xff] }
 0x1c9   :  { %v1903_v37 = vpop.f32.mrf.mxu2  ;;  %v2649_v38 = vpop.f32.mrf.mxu3  ;;  %v1451_v41 = vmax.f32 %v705_v36, %v1387_v44 }
 0x1ca   :  { %v2942_v43 = vmax.f32 %v2196_v35, %v2878_v33  ;;  %v2005_v45 = vmul.f32 %v4670_v59, %v1903_v37  ;;  %v2751_v46 = vmul.f32 %v4670_v59, %v2649_v38  ;;  %v472_v47 = vpop.f32.mrf.mxu0  ;;  %v1160_v48 = vpop.f32.mrf.mxu1  ;;  %v5113_v33 = vld [vmem:[%s5425_s3] ss:$0 sm:$0xff] }
 0x1cb   :  { %v575_v51 = vmul.f32 %v4670_v59, %v472_v47  ;;  %v1260_v52 = vmul.f32 %v4670_v59, %v1160_v48 }
 0x1cc   :  { %v3006_v40 = vpack.c.bf16 %v2942_v43, %v2942_v43  ;;  %v2069_v53 = vadd.f32 %v4679_v4, %v2005_v45  ;;  %v2815_v54 = vadd.f32 %v4679_v4, %v2751_v46 }
 0x1cd   :  { %v642_v55 = vadd.f32 %v4679_v4, %v575_v51  ;;  %v1324_v56 = vadd.f32 %v4679_v4, %v1260_v52  ;;  %3265 = vmatmul.msk.bf16.gmra.mxu0 %vm259_vm2, %v3971_v39  ;;  %3489 = vmatmul.msk.bf16.gmra.mxu1 %vm259_vm2, %v4003_v42 }
 0x1ce   :  { %3071 = vst.msk [vmem:[%s5427_s4 + $0x98] sm:$0xf] %vm3032_vm3, %v3006_v40  ;;  %v2133_v57 = vmax.f32 %v2069_v53, 0.0  ;;  %3713 = vmatmul.msk.bf16.gmra.mxu2 %vm259_vm2, %v4035_v49  ;;  %3937 = vmatmul.msk.bf16.gmra.mxu3 %vm259_vm2, %v4067_v50  ;;  %v2879_v60 = vmax.f32 %v2815_v54, 0.0 }
 0x1cf   :  { %v706_v61 = vmax.f32 %v642_v55, 0.0  ;;  %v1388_v62 = vmax.f32 %v1324_v56, 0.0 }
 0x1d0   :  { %v2197_v58 = vmax.f32 %v1451_v41, %v2133_v57 }
 0x1d1   :  { %v1906_v63 = vpop.f32.mrf.mxu2  ;;  %v2652_v0 = vpop.f32.mrf.mxu3  ;;  %v1452_v10 = vmax.f32 %v706_v61, %v1388_v62 }
 0x1d2   :  { %v2943_v1 = vmax.f32 %v2197_v58, %v2879_v60  ;;  %v2006_v2 = vmul.f32 %v4670_v59, %v1906_v63  ;;  %v2752_v3 = vmul.f32 %v4670_v59, %v2652_v0  ;;  %v474_v5 = vpop.f32.mrf.mxu0  ;;  %v1162_v6 = vpop.f32.mrf.mxu1 }
 0x1d3   :  { %v576_v7 = vmul.f32 %v4670_v59, %v474_v5  ;;  %v1261_v8 = vmul.f32 %v4670_v59, %v1162_v6 }
 0x1d4   :  { %v3007_v9 = vpack.c.bf16 %v2943_v1, %v2943_v1  ;;  %v2070_v11 = vadd.f32 %v4679_v4, %v2006_v2  ;;  %v2816_v12 = vadd.f32 %v4679_v4, %v2752_v3  ;;  %v3973_v2 = vld [vmem:[%s5426_s0 + $0xf0] sm:$0xff] }
 0x1d5   :  { %v643_v13 = vadd.f32 %v4679_v4, %v576_v7  ;;  %v1325_v16 = vadd.f32 %v4679_v4, %v1261_v8  ;;  %v4005_v3 = vld [vmem:[%s5426_s0 + $0x1f0] sm:$0xff] }
 0x1d6   :  { %3072 = vst.msk [vmem:[%s5427_s4 + $0x9c] sm:$0xf] %vm3032_vm3, %v3007_v9  ;;  %v2134_v14 = vmax.f32 %v2070_v11, 0.0  ;;  %v2880_v15 = vmax.f32 %v2816_v12, 0.0  ;;  %v4037_v11 = vld [vmem:[%s5426_s0 + $0x2f0] sm:$0xff] }
 0x1d7   :  { %v707_v18 = vmax.f32 %v643_v13, 0.0  ;;  %v1389_v23 = vmax.f32 %v1325_v16, 0.0  ;;  %v4069_v12 = vld [vmem:[%s5426_s0 + $0x3f0] sm:$0xff] }
 0x1d8   :  { %v2198_v17 = vmax.f32 %v1452_v10, %v2134_v14 }
 0x1d9   :  { %v1908_v59 = vpop.f32.mrf.mxu2  ;;  %v2654_v19 = vpop.f32.mrf.mxu3  ;;  %v1453_v38 = vmax.f32 %v707_v18, %v1389_v23 }
 0x1da   :  { %v2944_v22 = vmax.f32 %v2198_v17, %v2880_v15  ;;  %v2007_v4 = vmul.f32 %v5098_v24, %v1908_v59  ;;  %v2753_v25 = vmul.f32 %v5098_v24, %v2654_v19  ;;  %v477_v26 = vpop.f32.mrf.mxu0  ;;  %v1165_v27 = vpop.f32.mrf.mxu1 }
 0x1db   :  { %v577_v30 = vmul.f32 %v5098_v24, %v477_v26  ;;  %v1262_v31 = vmul.f32 %v5098_v24, %v1165_v27 }
 0x1dc   :  { %v3008_v32 = vpack.c.bf16 %v2944_v22, %v2944_v22  ;;  %v2071_v34 = vadd.f32 %v5113_v33, %v2007_v4  ;;  %v2817_v35 = vadd.f32 %v5113_v33, %v2753_v25 }
 0x1dd   :  { %v644_v36 = vadd.f32 %v5113_v33, %v577_v30  ;;  %v1326_v37 = vadd.f32 %v5113_v33, %v1262_v31  ;;  %3266 = vmatmul.msk.bf16.gmra.mxu0 %vm259_vm2, %v3972_v20  ;;  %3490 = vmatmul.msk.bf16.gmra.mxu1 %vm259_vm2, %v4004_v21 }
 0x1de   :  { %3073 = vst.msk [vmem:[%s5427_s4 + $0xa0] sm:$0xf] %vm3032_vm3, %v3008_v32  ;;  %v2135_v39 = vmax.f32 %v2071_v34, 0.0  ;;  %3714 = vmatmul.msk.bf16.gmra.mxu2 %vm259_vm2, %v4036_v28  ;;  %3938 = vmatmul.msk.bf16.gmra.mxu3 %vm259_vm2, %v4068_v29  ;;  %v2881_v43 = vmax.f32 %v2817_v35, 0.0 }
 0x1df   :  { %v708_v44 = vmax.f32 %v644_v36, 0.0  ;;  %v1390_v45 = vmax.f32 %v1326_v37, 0.0 }
 0x1e0   :  { %v2199_v42 = vmax.f32 %v1453_v38, %v2135_v39 }
 0x1e1   :  { %v1911_v46 = vpop.f32.mrf.mxu2  ;;  %v2657_v47 = vpop.f32.mrf.mxu3  ;;  %v1454_v55 = vmax.f32 %v708_v44, %v1390_v45 }
 0x1e2   :  { %v2945_v48 = vmax.f32 %v2199_v42, %v2881_v43  ;;  %v2008_v49 = vmul.f32 %v5098_v24, %v1911_v46  ;;  %v2754_v50 = vmul.f32 %v5098_v24, %v2657_v47  ;;  %v479_v51 = vpop.f32.mrf.mxu0  ;;  %v1167_v52 = vpop.f32.mrf.mxu1 }
 0x1e3   :  { %v578_v40 = vmul.f32 %v5098_v24, %v479_v51  ;;  %v1263_v53 = vmul.f32 %v5098_v24, %v1167_v52 }
 0x1e4   :  { %v3009_v54 = vpack.c.bf16 %v2945_v48, %v2945_v48  ;;  %v2072_v56 = vadd.f32 %v5113_v33, %v2008_v49  ;;  %v2818_v41 = vadd.f32 %v5113_v33, %v2754_v50  ;;  %v3974_v49 = vld [vmem:[%s5426_s0 + $0xf8] sm:$0xff] }
 0x1e5   :  { %v645_v57 = vadd.f32 %v5113_v33, %v578_v40  ;;  %v1327_v61 = vadd.f32 %v5113_v33, %v1263_v53  ;;  %v4006_v50 = vld [vmem:[%s5426_s0 + $0x1f8] sm:$0xff] }
 0x1e6   :  { %3074 = vst.msk [vmem:[%s5427_s4 + $0xa4] sm:$0xf] %vm3032_vm3, %v3009_v54  ;;  %v2136_v58 = vmax.f32 %v2072_v56, 0.0  ;;  %v2882_v60 = vmax.f32 %v2818_v41, 0.0  ;;  %v4038_v56 = vld [vmem:[%s5426_s0 + $0x2f8] sm:$0xff] }
 0x1e7   :  { %v709_v63 = vmax.f32 %v645_v57, 0.0  ;;  %v1391_v6 = vmax.f32 %v1327_v61, 0.0  ;;  %v4070_v41 = vld [vmem:[%s5426_s0 + $0x3f8] sm:$0xff] }
 0x1e8   :  { %v2200_v62 = vmax.f32 %v1454_v55, %v2136_v58 }
 0x1e9   :  { %v1913_v0 = vpop.f32.mrf.mxu2  ;;  %v2659_v1 = vpop.f32.mrf.mxu3  ;;  %v1455_v19 = vmax.f32 %v709_v63, %v1391_v6 }
 0x1ea   :  { %v2946_v5 = vmax.f32 %v2200_v62, %v2882_v60  ;;  %v2009_v7 = vmul.f32 %v5098_v24, %v1913_v0  ;;  %v2755_v8 = vmul.f32 %v5098_v24, %v2659_v1  ;;  %v482_v9 = vpop.f32.mrf.mxu0  ;;  %v1170_v10 = vpop.f32.mrf.mxu1 }
 0x1eb   :  { %v579_v13 = vmul.f32 %v5098_v24, %v482_v9  ;;  %v1264_v14 = vmul.f32 %v5098_v24, %v1170_v10 }
 0x1ec   :  { %v3010_v15 = vpack.c.bf16 %v2946_v5, %v2946_v5  ;;  %v2073_v16 = vadd.f32 %v5113_v33, %v2009_v7  ;;  %v2819_v17 = vadd.f32 %v5113_v33, %v2755_v8 }
 0x1ed   :  { %v646_v18 = vadd.f32 %v5113_v33, %v579_v13  ;;  %v1328_v59 = vadd.f32 %v5113_v33, %v1264_v14  ;;  %3267 = vmatmul.msk.bf16.gmra.mxu0 %vm259_vm2, %v3973_v2  ;;  %3491 = vmatmul.msk.bf16.gmra.mxu1 %vm259_vm2, %v4005_v3 }
 0x1ee   :  { %3075 = vst.msk [vmem:[%s5427_s4 + $0xa8] sm:$0xf] %vm3032_vm3, %v3010_v15  ;;  %v2137_v20 = vmax.f32 %v2073_v16, 0.0  ;;  %3715 = vmatmul.msk.bf16.gmra.mxu2 %vm259_vm2, %v4037_v11  ;;  %3939 = vmatmul.msk.bf16.gmra.mxu3 %vm259_vm2, %v4069_v12  ;;  %v2883_v22 = vmax.f32 %v2819_v17, 0.0 }
 0x1ef   :  { %v710_v23 = vmax.f32 %v646_v18, 0.0  ;;  %v1392_v4 = vmax.f32 %v1328_v59, 0.0 }
 0x1f0   :  { %v2201_v21 = vmax.f32 %v1455_v19, %v2137_v20 }
 0x1f1   :  { %v1916_v25 = vpop.f32.mrf.mxu2  ;;  %v2662_v26 = vpop.f32.mrf.mxu3  ;;  %v1456_v36 = vmax.f32 %v710_v23, %v1392_v4 }
 0x1f2   :  { %v2947_v27 = vmax.f32 %v2201_v21, %v2883_v22  ;;  %v2010_v28 = vmul.f32 %v5098_v24, %v1916_v25  ;;  %v2756_v29 = vmul.f32 %v5098_v24, %v2662_v26  ;;  %v484_v30 = vpop.f32.mrf.mxu0  ;;  %v1172_v31 = vpop.f32.mrf.mxu1 }
 0x1f3   :  { %v580_v32 = vmul.f32 %v5098_v24, %v484_v30  ;;  %v1265_v34 = vmul.f32 %v5098_v24, %v1172_v31 }
 0x1f4   :  { %v3011_v35 = vpack.c.bf16 %v2947_v27, %v2947_v27  ;;  %v2074_v37 = vadd.f32 %v5113_v33, %v2010_v28  ;;  %v2820_v38 = vadd.f32 %v5113_v33, %v2756_v29 }
 0x1f5   :  { %v647_v39 = vadd.f32 %v5113_v33, %v580_v32  ;;  %v1329_v44 = vadd.f32 %v5113_v33, %v1265_v34 }
 0x1f6   :  { %3076 = vst.msk [vmem:[%s5427_s4 + $0xac] sm:$0xf] %vm3032_vm3, %v3011_v35  ;;  %v2138_v42 = vmax.f32 %v2074_v37, 0.0  ;;  %v2884_v43 = vmax.f32 %v2820_v38, 0.0 }
 0x1f7   :  { %v711_v46 = vmax.f32 %v647_v39, 0.0  ;;  %v1393_v52 = vmax.f32 %v1329_v44, 0.0 }
 0x1f8   :  { %v2202_v45 = vmax.f32 %v1456_v36, %v2138_v42 }
 0x1f9   :  { %v1918_v47 = vpop.f32.mrf.mxu2  ;;  %v2664_v48 = vpop.f32.mrf.mxu3  ;;  %v1457_v1 = vmax.f32 %v711_v46, %v1393_v52 }
 0x1fa   :  { %v2948_v51 = vmax.f32 %v2202_v45, %v2884_v43  ;;  %v2011_v40 = vmul.f32 %v5098_v24, %v1918_v47  ;;  %v2757_v53 = vmul.f32 %v5098_v24, %v2664_v48  ;;  %v487_v54 = vpop.f32.mrf.mxu0  ;;  %v1175_v55 = vpop.f32.mrf.mxu1 }
 0x1fb   :  { %v581_v57 = vmul.f32 %v5098_v24, %v487_v54  ;;  %v1266_v58 = vmul.f32 %v5098_v24, %v1175_v55 }
 0x1fc   :  { %v3012_v60 = vpack.c.bf16 %v2948_v51, %v2948_v51  ;;  %v2075_v61 = vadd.f32 %v5113_v33, %v2011_v40  ;;  %v2821_v62 = vadd.f32 %v5113_v33, %v2757_v53 }
 0x1fd   :  { %v648_v63 = vadd.f32 %v5113_v33, %v581_v57  ;;  %v1330_v0 = vadd.f32 %v5113_v33, %v1266_v58  ;;  %3268 = vmatmul.msk.bf16.gmra.mxu0 %vm259_vm2, %v3974_v49  ;;  %3492 = vmatmul.msk.bf16.gmra.mxu1 %vm259_vm2, %v4006_v50 }
 0x1fe   :  { %3077 = vst.msk [vmem:[%s5427_s4 + $0xb0] sm:$0xf] %vm3032_vm3, %v3012_v60  ;;  %v2139_v2 = vmax.f32 %v2075_v61, 0.0  ;;  %3716 = vmatmul.msk.bf16.gmra.mxu2 %vm259_vm2, %v4038_v56  ;;  %3940 = vmatmul.msk.bf16.gmra.mxu3 %vm259_vm2, %v4070_v41  ;;  %v2885_v5 = vmax.f32 %v2821_v62, 0.0 }
 0x1ff   :  { %v712_v6 = vmax.f32 %v648_v63, 0.0  ;;  %v1394_v7 = vmax.f32 %v1330_v0, 0.0 }
 0x200   :  { %v2203_v3 = vmax.f32 %v1457_v1, %v2139_v2 }
 0x201   :  { %v1921_v8 = vpop.f32.mrf.mxu2  ;;  %v2667_v9 = vpop.f32.mrf.mxu3  ;;  %v1458_v18 = vmax.f32 %v712_v6, %v1394_v7 }
 0x202   :  { %v2949_v10 = vmax.f32 %v2203_v3, %v2885_v5  ;;  %v2012_v11 = vmul.f32 %v5098_v24, %v1921_v8  ;;  %v2758_v12 = vmul.f32 %v5098_v24, %v2667_v9  ;;  %v489_v13 = vpop.f32.mrf.mxu0  ;;  %v1177_v14 = vpop.f32.mrf.mxu1 }
 0x203   :  { %v582_v15 = vmul.f32 %v5098_v24, %v489_v13  ;;  %v1267_v16 = vmul.f32 %v5098_v24, %v1177_v14 }
 0x204   :  { %v3013_v17 = vpack.c.bf16 %v2949_v10, %v2949_v10  ;;  %v2076_v59 = vadd.f32 %v5113_v33, %v2012_v11  ;;  %v2822_v19 = vadd.f32 %v5113_v33, %v2758_v12 }
 0x205   :  { %v649_v20 = vadd.f32 %v5113_v33, %v582_v15  ;;  %v1331_v23 = vadd.f32 %v5113_v33, %v1267_v16 }
 0x206   :  { %3078 = vst.msk [vmem:[%s5427_s4 + $0xb4] sm:$0xf] %vm3032_vm3, %v3013_v17  ;;  %v2140_v21 = vmax.f32 %v2076_v59, 0.0  ;;  %v2886_v22 = vmax.f32 %v2822_v19, 0.0 }
 0x207   :  { %v713_v25 = vmax.f32 %v649_v20, 0.0  ;;  %v1395_v29 = vmax.f32 %v1331_v23, 0.0 }
 0x208   :  { %v2204_v4 = vmax.f32 %v1458_v18, %v2140_v21 }
 0x209   :  { %v1923_v26 = vpop.f32.mrf.mxu2  ;;  %v2669_v27 = vpop.f32.mrf.mxu3  ;;  %v1459_v44 = vmax.f32 %v713_v25, %v1395_v29 }
 0x20a   :  { %v2950_v28 = vmax.f32 %v2204_v4, %v2886_v22  ;;  %v2013_v30 = vmul.f32 %v5098_v24, %v1923_v26  ;;  %v2759_v31 = vmul.f32 %v5098_v24, %v2669_v27  ;;  %v492_v32 = vpop.f32.mrf.mxu0  ;;  %v1180_v34 = vpop.f32.mrf.mxu1 }
 0x20b   :  { %v583_v35 = vmul.f32 %v5098_v24, %v492_v32  ;;  %v1268_v36 = vmul.f32 %v5098_v24, %v1180_v34 }
 0x20c   :  { %v3014_v37 = vpack.c.bf16 %v2950_v28, %v2950_v28  ;;  %v2077_v38 = vadd.f32 %v5113_v33, %v2013_v30  ;;  %v2823_v39 = vadd.f32 %v5113_v33, %v2759_v31 }
 0x20d   :  { %v650_v42 = vadd.f32 %v5113_v33, %v583_v35  ;;  %v1332_v43 = vadd.f32 %v5113_v33, %v1268_v36 }
 0x20e   :  { %3079 = vst.msk [vmem:[%s5427_s4 + $0xb8] sm:$0xf] %vm3032_vm3, %v3014_v37  ;;  %v2141_v45 = vmax.f32 %v2077_v38, 0.0  ;;  %v2887_v47 = vmax.f32 %v2823_v39, 0.0 }
 0x20f   :  { %v714_v48 = vmax.f32 %v650_v42, 0.0  ;;  %v1396_v49 = vmax.f32 %v1332_v43, 0.0 }
 0x210   :  { %v2205_v46 = vmax.f32 %v1459_v44, %v2141_v45 }
 0x211   :  { %v1926_v50 = vpop.f32.mrf.mxu2  ;;  %v2672_v51 = vpop.f32.mrf.mxu3  ;;  %v1460_v58 = vmax.f32 %v714_v48, %v1396_v49 }
 0x212   :  { %v2951_v52 = vmax.f32 %v2205_v46, %v2887_v47  ;;  %v2014_v40 = vmul.f32 %v5098_v24, %v1926_v50  ;;  %v2760_v53 = vmul.f32 %v5098_v24, %v2672_v51  ;;  %v494_v54 = vpop.f32.mrf.mxu0  ;;  %v1182_v55 = vpop.f32.mrf.mxu1 }
 0x213   :  { %v584_v56 = vmul.f32 %v5098_v24, %v494_v54  ;;  %v1269_v41 = vmul.f32 %v5098_v24, %v1182_v55 }
 0x214   :  { %v3015_v57 = vpack.c.bf16 %v2951_v52, %v2951_v52  ;;  %v2078_v60 = vadd.f32 %v5113_v33, %v2014_v40  ;;  %v2824_v61 = vadd.f32 %v5113_v33, %v2760_v53 }
 0x215   :  { %v651_v62 = vadd.f32 %v5113_v33, %v584_v56  ;;  %v1333_v1 = vadd.f32 %v5113_v33, %v1269_v41 }
 0x216   :  { %3080 = vst.msk [vmem:[%s5427_s4 + $0xbc] sm:$0xf] %vm3032_vm3, %v3015_v57  ;;  %v2142_v63 = vmax.f32 %v2078_v60, 0.0  ;;  %v2888_v0 = vmax.f32 %v2824_v61, 0.0 }
 0x217   :  { %v715_v3 = vmax.f32 %v651_v62, 0.0  ;;  %v1397_v8 = vmax.f32 %v1333_v1, 0.0 }
 0x218   :  { %v2206_v2 = vmax.f32 %v1460_v58, %v2142_v63 }
 0x219   :  { %v1928_v5 = vpop.f32.mrf.mxu2  ;;  %v2674_v6 = vpop.f32.mrf.mxu3  ;;  %v1461_v19 = vmax.f32 %v715_v3, %v1397_v8 }
 0x21a   :  { %v2952_v7 = vmax.f32 %v2206_v2, %v2888_v0  ;;  %v2015_v9 = vmul.f32 %v5098_v24, %v1928_v5  ;;  %v2761_v10 = vmul.f32 %v5098_v24, %v2674_v6  ;;  %v497_v11 = vpop.f32.mrf.mxu0  ;;  %v1185_v12 = vpop.f32.mrf.mxu1 }
 0x21b   :  { %v585_v13 = vmul.f32 %v5098_v24, %v497_v11  ;;  %v1270_v14 = vmul.f32 %v5098_v24, %v1185_v12 }
 0x21c   :  { %v3016_v15 = vpack.c.bf16 %v2952_v7, %v2952_v7  ;;  %v2079_v16 = vadd.f32 %v5113_v33, %v2015_v9  ;;  %v2825_v17 = vadd.f32 %v5113_v33, %v2761_v10 }
 0x21d   :  { %v652_v18 = vadd.f32 %v5113_v33, %v585_v13  ;;  %v1334_v59 = vadd.f32 %v5113_v33, %v1270_v14 }
 0x21e   :  { %3081 = vst.msk [vmem:[%s5427_s4 + $0xc0] sm:$0xf] %vm3032_vm3, %v3016_v15  ;;  %v2143_v20 = vmax.f32 %v2079_v16, 0.0  ;;  %v2889_v22 = vmax.f32 %v2825_v17, 0.0 }
 0x21f   :  { %v716_v23 = vmax.f32 %v652_v18, 0.0  ;;  %v1398_v4 = vmax.f32 %v1334_v59, 0.0 }
 0x220   :  { %v2207_v21 = vmax.f32 %v1461_v19, %v2143_v20 }
 0x221   :  { %v1931_v25 = vpop.f32.mrf.mxu2  ;;  %v2677_v26 = vpop.f32.mrf.mxu3  ;;  %v1462_v36 = vmax.f32 %v716_v23, %v1398_v4 }
 0x222   :  { %v2953_v27 = vmax.f32 %v2207_v21, %v2889_v22  ;;  %v2016_v28 = vmul.f32 %v5098_v24, %v1931_v25  ;;  %v2762_v29 = vmul.f32 %v5098_v24, %v2677_v26  ;;  %v499_v30 = vpop.f32.mrf.mxu0  ;;  %v1187_v31 = vpop.f32.mrf.mxu1 }
 0x223   :  { %v586_v32 = vmul.f32 %v5098_v24, %v499_v30  ;;  %v1271_v34 = vmul.f32 %v5098_v24, %v1187_v31 }
 0x224   :  { %v3017_v35 = vpack.c.bf16 %v2953_v27, %v2953_v27  ;;  %v2080_v37 = vadd.f32 %v5113_v33, %v2016_v28  ;;  %v2826_v38 = vadd.f32 %v5113_v33, %v2762_v29 }
 0x225   :  { %v653_v39 = vadd.f32 %v5113_v33, %v586_v32  ;;  %v1335_v44 = vadd.f32 %v5113_v33, %v1271_v34 }
 0x226   :  { %3082 = vst.msk [vmem:[%s5427_s4 + $0xc4] sm:$0xf] %vm3032_vm3, %v3017_v35  ;;  %v2144_v42 = vmax.f32 %v2080_v37, 0.0  ;;  %v2890_v43 = vmax.f32 %v2826_v38, 0.0 }
 0x227   :  { %v717_v46 = vmax.f32 %v653_v39, 0.0  ;;  %v1399_v50 = vmax.f32 %v1335_v44, 0.0 }
 0x228   :  { %v2208_v45 = vmax.f32 %v1462_v36, %v2144_v42 }
 0x229   :  { %v1933_v47 = vpop.f32.mrf.mxu2  ;;  %v2679_v48 = vpop.f32.mrf.mxu3  ;;  %v1463_v61 = vmax.f32 %v717_v46, %v1399_v50 }
 0x22a   :  { %v2954_v49 = vmax.f32 %v2208_v45, %v2890_v43  ;;  %v2017_v51 = vmul.f32 %v5098_v24, %v1933_v47  ;;  %v2763_v52 = vmul.f32 %v5098_v24, %v2679_v48  ;;  %v502_v40 = vpop.f32.mrf.mxu0  ;;  %v1190_v53 = vpop.f32.mrf.mxu1 }
 0x22b   :  { %v587_v54 = vmul.f32 %v5098_v24, %v502_v40  ;;  %v1272_v55 = vmul.f32 %v5098_v24, %v1190_v53 }
 0x22c   :  { %v3018_v56 = vpack.c.bf16 %v2954_v49, %v2954_v49  ;;  %v2081_v41 = vadd.f32 %v5113_v33, %v2017_v51  ;;  %v2827_v57 = vadd.f32 %v5113_v33, %v2763_v52 }
 0x22d   :  { %v654_v58 = vadd.f32 %v5113_v33, %v587_v54  ;;  %v1336_v60 = vadd.f32 %v5113_v33, %v1272_v55 }
 0x22e   :  { %3083 = vst.msk [vmem:[%s5427_s4 + $0xc8] sm:$0xf] %vm3032_vm3, %v3018_v56  ;;  %v2145_v62 = vmax.f32 %v2081_v41, 0.0  ;;  %v2891_v0 = vmax.f32 %v2827_v57, 0.0 }
 0x22f   :  { %v718_v1 = vmax.f32 %v654_v58, 0.0  ;;  %v1400_v2 = vmax.f32 %v1336_v60, 0.0 }
 0x230   :  { %v2209_v63 = vmax.f32 %v1463_v61, %v2145_v62 }
 0x231   :  { %v1936_v3 = vpop.f32.mrf.mxu2  ;;  %v2682_v5 = vpop.f32.mrf.mxu3  ;;  %v1464_v14 = vmax.f32 %v718_v1, %v1400_v2 }
 0x232   :  { %v2955_v6 = vmax.f32 %v2209_v63, %v2891_v0  ;;  %v2018_v7 = vmul.f32 %v5098_v24, %v1936_v3  ;;  %v2764_v8 = vmul.f32 %v5098_v24, %v2682_v5  ;;  %v504_v9 = vpop.f32.mrf.mxu0  ;;  %v1192_v10 = vpop.f32.mrf.mxu1 }
 0x233   :  { %v588_v11 = vmul.f32 %v5098_v24, %v504_v9  ;;  %v1273_v12 = vmul.f32 %v5098_v24, %v1192_v10 }
 0x234   :  { %v3019_v13 = vpack.c.bf16 %v2955_v6, %v2955_v6  ;;  %v2082_v15 = vadd.f32 %v5113_v33, %v2018_v7  ;;  %v2828_v16 = vadd.f32 %v5113_v33, %v2764_v8 }
 0x235   :  { %v655_v17 = vadd.f32 %v5113_v33, %v588_v11  ;;  %v1337_v19 = vadd.f32 %v5113_v33, %v1273_v12 }
 0x236   :  { %3084 = vst.msk [vmem:[%s5427_s4 + $0xcc] sm:$0xf] %vm3032_vm3, %v3019_v13  ;;  %v2146_v18 = vmax.f32 %v2082_v15, 0.0  ;;  %v2892_v59 = vmax.f32 %v2828_v16, 0.0 }
 0x237   :  { %v719_v21 = vmax.f32 %v655_v17, 0.0  ;;  %v1401_v25 = vmax.f32 %v1337_v19, 0.0 }
 0x238   :  { %v2210_v20 = vmax.f32 %v1464_v14, %v2146_v18 }
 0x239   :  { %v1938_v22 = vpop.f32.mrf.mxu2  ;;  %v2684_v23 = vpop.f32.mrf.mxu3  ;;  %v1465_v38 = vmax.f32 %v719_v21, %v1401_v25 }
 0x23a   :  { %v2956_v4 = vmax.f32 %v2210_v20, %v2892_v59  ;;  %v2019_v26 = vmul.f32 %v5098_v24, %v1938_v22  ;;  %v2765_v27 = vmul.f32 %v5098_v24, %v2684_v23  ;;  %v507_v28 = vpop.f32.mrf.mxu0  ;;  %v1195_v29 = vpop.f32.mrf.mxu1 }
 0x23b   :  { %v589_v30 = vmul.f32 %v5098_v24, %v507_v28  ;;  %v1274_v31 = vmul.f32 %v5098_v24, %v1195_v29 }
 0x23c   :  { %v3020_v32 = vpack.c.bf16 %v2956_v4, %v2956_v4  ;;  %v2083_v34 = vadd.f32 %v5113_v33, %v2019_v26  ;;  %v2829_v35 = vadd.f32 %v5113_v33, %v2765_v27 }
 0x23d   :  { %v656_v36 = vadd.f32 %v5113_v33, %v589_v30  ;;  %v1338_v37 = vadd.f32 %v5113_v33, %v1274_v31 }
 0x23e   :  { %3085 = vst.msk [vmem:[%s5427_s4 + $0xd0] sm:$0xf] %vm3032_vm3, %v3020_v32  ;;  %v2147_v39 = vmax.f32 %v2083_v34, 0.0  ;;  %v2893_v43 = vmax.f32 %v2829_v35, 0.0 }
 0x23f   :  { %v720_v44 = vmax.f32 %v656_v36, 0.0  ;;  %v1402_v45 = vmax.f32 %v1338_v37, 0.0 }
 0x240   :  { %v2211_v42 = vmax.f32 %v1465_v38, %v2147_v39 }
 0x241   :  { %v1941_v46 = vpop.f32.mrf.mxu2  ;;  %v2687_v47 = vpop.f32.mrf.mxu3  ;;  %v1466_v55 = vmax.f32 %v720_v44, %v1402_v45 }
 0x242   :  { %v2957_v48 = vmax.f32 %v2211_v42, %v2893_v43  ;;  %v2020_v49 = vmul.f32 %v5098_v24, %v1941_v46  ;;  %v2766_v50 = vmul.f32 %v5098_v24, %v2687_v47  ;;  %v509_v51 = vpop.f32.mrf.mxu0  ;;  %v1197_v52 = vpop.f32.mrf.mxu1 }
 0x243   :  { %v590_v40 = vmul.f32 %v5098_v24, %v509_v51  ;;  %v1275_v53 = vmul.f32 %v5098_v24, %v1197_v52 }
 0x244   :  { %v3021_v54 = vpack.c.bf16 %v2957_v48, %v2957_v48  ;;  %v2084_v56 = vadd.f32 %v5113_v33, %v2020_v49  ;;  %v2830_v41 = vadd.f32 %v5113_v33, %v2766_v50 }
 0x245   :  { %v657_v57 = vadd.f32 %v5113_v33, %v590_v40  ;;  %v1339_v61 = vadd.f32 %v5113_v33, %v1275_v53 }
 0x246   :  { %3086 = vst.msk [vmem:[%s5427_s4 + $0xd4] sm:$0xf] %vm3032_vm3, %v3021_v54  ;;  %v2148_v58 = vmax.f32 %v2084_v56, 0.0  ;;  %v2894_v60 = vmax.f32 %v2830_v41, 0.0 }
 0x247   :  { %v721_v63 = vmax.f32 %v657_v57, 0.0  ;;  %v1403_v3 = vmax.f32 %v1339_v61, 0.0 }
 0x248   :  { %v2212_v62 = vmax.f32 %v1466_v55, %v2148_v58 }
 0x249   :  { %v1943_v0 = vpop.f32.mrf.mxu2  ;;  %v2689_v1 = vpop.f32.mrf.mxu3  ;;  %v1467_v16 = vmax.f32 %v721_v63, %v1403_v3 }
 0x24a   :  { %v2958_v2 = vmax.f32 %v2212_v62, %v2894_v60  ;;  %v2021_v5 = vmul.f32 %v5098_v24, %v1943_v0  ;;  %v2767_v6 = vmul.f32 %v5098_v24, %v2689_v1  ;;  %v512_v7 = vpop.f32.mrf.mxu0  ;;  %v1200_v8 = vpop.f32.mrf.mxu1 }
 0x24b   :  { %v591_v9 = vmul.f32 %v5098_v24, %v512_v7  ;;  %v1276_v10 = vmul.f32 %v5098_v24, %v1200_v8 }
 0x24c   :  { %v3022_v11 = vpack.c.bf16 %v2958_v2, %v2958_v2  ;;  %v2085_v12 = vadd.f32 %v5113_v33, %v2021_v5  ;;  %v2831_v13 = vadd.f32 %v5113_v33, %v2767_v6 }
 0x24d   :  { %v658_v14 = vadd.f32 %v5113_v33, %v591_v9  ;;  %v1340_v15 = vadd.f32 %v5113_v33, %v1276_v10 }
 0x24e   :  { %3087 = vst.msk [vmem:[%s5427_s4 + $0xd8] sm:$0xf] %vm3032_vm3, %v3022_v11  ;;  %v2149_v17 = vmax.f32 %v2085_v12, 0.0  ;;  %v2895_v59 = vmax.f32 %v2831_v13, 0.0 }
 0x24f   :  { %v722_v19 = vmax.f32 %v658_v14, 0.0  ;;  %v1404_v20 = vmax.f32 %v1340_v15, 0.0 }
 0x250   :  { %v2213_v18 = vmax.f32 %v1467_v16, %v2149_v17 }
 0x251   :  { %v1946_v21 = vpop.f32.mrf.mxu2  ;;  %v2692_v22 = vpop.f32.mrf.mxu3  ;;  %v1468_v31 = vmax.f32 %v722_v19, %v1404_v20 }
 0x252   :  { %v2959_v23 = vmax.f32 %v2213_v18, %v2895_v59  ;;  %v2022_v4 = vmul.f32 %v5098_v24, %v1946_v21  ;;  %v2768_v25 = vmul.f32 %v5098_v24, %v2692_v22  ;;  %v514_v26 = vpop.f32.mrf.mxu0  ;;  %v1202_v27 = vpop.f32.mrf.mxu1 }
 0x253   :  { %v592_v28 = vmul.f32 %v5098_v24, %v514_v26  ;;  %v1277_v29 = vmul.f32 %v5098_v24, %v1202_v27 }
 0x254   :  { %v3023_v30 = vpack.c.bf16 %v2959_v23, %v2959_v23  ;;  %v2086_v32 = vadd.f32 %v5113_v33, %v2022_v4  ;;  %v2832_v34 = vadd.f32 %v5113_v33, %v2768_v25 }
 0x255   :  { %v659_v35 = vadd.f32 %v5113_v33, %v592_v28  ;;  %v1341_v38 = vadd.f32 %v5113_v33, %v1277_v29 }
 0x256   :  { %3088 = vst.msk [vmem:[%s5427_s4 + $0xdc] sm:$0xf] %vm3032_vm3, %v3023_v30  ;;  %v2150_v36 = vmax.f32 %v2086_v32, 0.0  ;;  %v2896_v37 = vmax.f32 %v2832_v34, 0.0 }
 0x257   :  { %v723_v42 = vmax.f32 %v659_v35, 0.0  ;;  %v1405_v46 = vmax.f32 %v1341_v38, 0.0 }
 0x258   :  { %v2214_v39 = vmax.f32 %v1468_v31, %v2150_v36 }
 0x259   :  { %v1948_v43 = vpop.f32.mrf.mxu2  ;;  %v2694_v44 = vpop.f32.mrf.mxu3  ;;  %v1469_v41 = vmax.f32 %v723_v42, %v1405_v46 }
 0x25a   :  { %v2960_v45 = vmax.f32 %v2214_v39, %v2896_v37  ;;  %v2023_v47 = vmul.f32 %v5098_v24, %v1948_v43  ;;  %v2769_v48 = vmul.f32 %v5098_v24, %v2694_v44  ;;  %v517_v49 = vpop.f32.mrf.mxu0  ;;  %v1205_v50 = vpop.f32.mrf.mxu1 }
 0x25b   :  { %v593_v51 = vmul.f32 %v5098_v24, %v517_v49  ;;  %v1278_v52 = vmul.f32 %v5098_v24, %v1205_v50 }
 0x25c   :  { %v3024_v40 = vpack.c.bf16 %v2960_v45, %v2960_v45  ;;  %v2087_v53 = vadd.f32 %v5113_v33, %v2023_v47  ;;  %v2833_v54 = vadd.f32 %v5113_v33, %v2769_v48 }
 0x25d   :  { %v660_v55 = vadd.f32 %v5113_v33, %v593_v51  ;;  %v1342_v56 = vadd.f32 %v5113_v33, %v1278_v52 }
 0x25e   :  { %3089 = vst.msk [vmem:[%s5427_s4 + $0xe0] sm:$0xf] %vm3032_vm3, %v3024_v40  ;;  %v2151_v57 = vmax.f32 %v2087_v53, 0.0  ;;  %v2897_v60 = vmax.f32 %v2833_v54, 0.0 }
 0x25f   :  { %v724_v61 = vmax.f32 %v660_v55, 0.0  ;;  %v1406_v62 = vmax.f32 %v1342_v56, 0.0 }
 0x260   :  { %v2215_v58 = vmax.f32 %v1469_v41, %v2151_v57 }
 0x261   :  { %v1951_v63 = vpop.f32.mrf.mxu2  ;;  %v2697_v0 = vpop.f32.mrf.mxu3  ;;  %v1470_v10 = vmax.f32 %v724_v61, %v1406_v62 }
 0x262   :  { %v2961_v1 = vmax.f32 %v2215_v58, %v2897_v60  ;;  %v2024_v2 = vmul.f32 %v5098_v24, %v1951_v63  ;;  %v2770_v3 = vmul.f32 %v5098_v24, %v2697_v0  ;;  %v519_v5 = vpop.f32.mrf.mxu0  ;;  %v1207_v6 = vpop.f32.mrf.mxu1 }
 0x263   :  { %v594_v7 = vmul.f32 %v5098_v24, %v519_v5  ;;  %v1279_v8 = vmul.f32 %v5098_v24, %v1207_v6 }
 0x264   :  { %v3025_v9 = vpack.c.bf16 %v2961_v1, %v2961_v1  ;;  %v2088_v11 = vadd.f32 %v5113_v33, %v2024_v2  ;;  %v2834_v12 = vadd.f32 %v5113_v33, %v2770_v3 }
 0x265   :  { %v661_v13 = vadd.f32 %v5113_v33, %v594_v7  ;;  %v1343_v16 = vadd.f32 %v5113_v33, %v1279_v8 }
 0x266   :  { %3090 = vst.msk [vmem:[%s5427_s4 + $0xe4] sm:$0xf] %vm3032_vm3, %v3025_v9  ;;  %v2152_v14 = vmax.f32 %v2088_v11, 0.0  ;;  %v2898_v15 = vmax.f32 %v2834_v12, 0.0 }
 0x267   :  { %v725_v18 = vmax.f32 %v661_v13, 0.0  ;;  %v1407_v21 = vmax.f32 %v1343_v16, 0.0 }
 0x268   :  { %v2216_v17 = vmax.f32 %v1470_v10, %v2152_v14 }
 0x269   :  { %v1953_v59 = vpop.f32.mrf.mxu2  ;;  %v2699_v19 = vpop.f32.mrf.mxu3  ;;  %v1471_v34 = vmax.f32 %v725_v18, %v1407_v21 }
 0x26a   :  { %v2962_v20 = vmax.f32 %v2216_v17, %v2898_v15  ;;  %v2025_v22 = vmul.f32 %v5098_v24, %v1953_v59  ;;  %v2771_v23 = vmul.f32 %v5098_v24, %v2699_v19  ;;  %v522_v4 = vpop.f32.mrf.mxu0  ;;  %v1210_v25 = vpop.f32.mrf.mxu1 }
 0x26b   :  { %v595_v26 = vmul.f32 %v5098_v24, %v522_v4  ;;  %v1280_v27 = vmul.f32 %v5098_v24, %v1210_v25 }
 0x26c   :  { %v3026_v28 = vpack.c.bf16 %v2962_v20, %v2962_v20  ;;  %v2089_v29 = vadd.f32 %v5113_v33, %v2025_v22  ;;  %v2835_v30 = vadd.f32 %v5113_v33, %v2771_v23 }
 0x26d   :  { %v662_v31 = vadd.f32 %v5113_v33, %v595_v26  ;;  %v1344_v32 = vadd.f32 %v5113_v33, %v1280_v27 }
 0x26e   :  { %3091 = vst.msk [vmem:[%s5427_s4 + $0xe8] sm:$0xf] %vm3032_vm3, %v3026_v28  ;;  %v2153_v35 = vmax.f32 %v2089_v29, 0.0  ;;  %v2899_v37 = vmax.f32 %v2835_v30, 0.0 }
 0x26f   :  { %v726_v38 = vmax.f32 %v662_v31, 0.0  ;;  %v1408_v39 = vmax.f32 %v1344_v32, 0.0 }
 0x270   :  { %v2217_v36 = vmax.f32 %v1471_v34, %v2153_v35 }
 0x271   :  { %v1956_v42 = vpop.f32.mrf.mxu2  ;;  %v2702_v43 = vpop.f32.mrf.mxu3  ;;  %v1472_v52 = vmax.f32 %v726_v38, %v1408_v39 }
 0x272   :  { %v2963_v44 = vmax.f32 %v2217_v36, %v2899_v37  ;;  %v2026_v45 = vmul.f32 %v5098_v24, %v1956_v42  ;;  %v2772_v46 = vmul.f32 %v5098_v24, %v2702_v43  ;;  %v524_v47 = vpop.f32.mrf.mxu0  ;;  %v1212_v48 = vpop.f32.mrf.mxu1 }
 0x273   :  { %v596_v49 = vmul.f32 %v5098_v24, %v524_v47  ;;  %v1281_v50 = vmul.f32 %v5098_v24, %v1212_v48 }
 0x274   :  { %v3027_v51 = vpack.c.bf16 %v2963_v44, %v2963_v44  ;;  %v2090_v40 = vadd.f32 %v5113_v33, %v2026_v45  ;;  %v2836_v53 = vadd.f32 %v5113_v33, %v2772_v46 }
 0x275   :  { %v663_v54 = vadd.f32 %v5113_v33, %v596_v49  ;;  %v1345_v41 = vadd.f32 %v5113_v33, %v1281_v50 }
 0x276   :  { %3092 = vst.msk [vmem:[%s5427_s4 + $0xec] sm:$0xf] %vm3032_vm3, %v3027_v51  ;;  %v2154_v55 = vmax.f32 %v2090_v40, 0.0  ;;  %v2900_v56 = vmax.f32 %v2836_v53, 0.0 }
 0x277   :  { %v727_v58 = vmax.f32 %v663_v54, 0.0  ;;  %v1409_v63 = vmax.f32 %v1345_v41, 0.0 }
 0x278   :  { %v2218_v57 = vmax.f32 %v1472_v52, %v2154_v55 }
 0x279   :  { %v1958_v60 = vpop.f32.mrf.mxu2  ;;  %v2704_v61 = vpop.f32.mrf.mxu3  ;;  %v1473_v12 = vmax.f32 %v727_v58, %v1409_v63 }
 0x27a   :  { %v2964_v62 = vmax.f32 %v2218_v57, %v2900_v56  ;;  %v2027_v0 = vmul.f32 %v5098_v24, %v1958_v60  ;;  %v2773_v1 = vmul.f32 %v5098_v24, %v2704_v61  ;;  %v527_v2 = vpop.f32.mrf.mxu0  ;;  %v1215_v3 = vpop.f32.mrf.mxu1 }
 0x27b   :  { %v597_v5 = vmul.f32 %v5098_v24, %v527_v2  ;;  %v1282_v6 = vmul.f32 %v5098_v24, %v1215_v3 }
 0x27c   :  { %v3028_v7 = vpack.c.bf16 %v2964_v62, %v2964_v62  ;;  %v2091_v8 = vadd.f32 %v5113_v33, %v2027_v0  ;;  %v2837_v9 = vadd.f32 %v5113_v33, %v2773_v1 }
 0x27d   :  { %v664_v10 = vadd.f32 %v5113_v33, %v597_v5  ;;  %v1346_v11 = vadd.f32 %v5113_v33, %v1282_v6 }
 0x27e   :  { %3093 = vst.msk [vmem:[%s5427_s4 + $0xf0] sm:$0xf] %vm3032_vm3, %v3028_v7  ;;  %v2155_v13 = vmax.f32 %v2091_v8, 0.0  ;;  %v2901_v15 = vmax.f32 %v2837_v9, 0.0 }
 0x27f   :  { %v728_v16 = vmax.f32 %v664_v10, 0.0  ;;  %v1410_v17 = vmax.f32 %v1346_v11, 0.0 }
 0x280   :  { %v2219_v14 = vmax.f32 %v1473_v12, %v2155_v13 }
 0x281   :  { %v1961_v18 = vpop.f32.mrf.mxu2  ;;  %v2707_v59 = vpop.f32.mrf.mxu3  ;;  %v1474_v27 = vmax.f32 %v728_v16, %v1410_v17 }
 0x282   :  { %v2965_v19 = vmax.f32 %v2219_v14, %v2901_v15  ;;  %v2028_v20 = vmul.f32 %v5098_v24, %v1961_v18  ;;  %v2774_v21 = vmul.f32 %v5098_v24, %v2707_v59  ;;  %v529_v22 = vpop.f32.mrf.mxu0  ;;  %v1217_v23 = vpop.f32.mrf.mxu1 }
 0x283   :  { %v598_v4 = vmul.f32 %v5098_v24, %v529_v22  ;;  %v1283_v25 = vmul.f32 %v5098_v24, %v1217_v23 }
 0x284   :  { %v3029_v26 = vpack.c.bf16 %v2965_v19, %v2965_v19  ;;  %v2092_v28 = vadd.f32 %v5113_v33, %v2028_v20  ;;  %v2838_v29 = vadd.f32 %v5113_v33, %v2774_v21 }
 0x285   :  { %v665_v30 = vadd.f32 %v5113_v33, %v598_v4  ;;  %v1347_v34 = vadd.f32 %v5113_v33, %v1283_v25 }
 0x286   :  { %3094 = vst.msk [vmem:[%s5427_s4 + $0xf4] sm:$0xf] %vm3032_vm3, %v3029_v26  ;;  %v2156_v31 = vmax.f32 %v2092_v28, 0.0  ;;  %v2902_v32 = vmax.f32 %v2838_v29, 0.0 }
 0x287   :  { %v729_v36 = vmax.f32 %v665_v30, 0.0  ;;  %v1411_v42 = vmax.f32 %v1347_v34, 0.0 }
 0x288   :  { %v2220_v35 = vmax.f32 %v1474_v27, %v2156_v31 }
 0x289   :  { %v1963_v37 = vpop.f32.mrf.mxu2  ;;  %v2709_v38 = vpop.f32.mrf.mxu3  ;;  %v1475_v48 = vmax.f32 %v729_v36, %v1411_v42 }
 0x28a   :  { %v2966_v39 = vmax.f32 %v2220_v35, %v2902_v32  ;;  %v2029_v43 = vmul.f32 %v5098_v24, %v1963_v37  ;;  %v2775_v44 = vmul.f32 %v5098_v24, %v2709_v38 }
 0x28c   :  { %v3030_v45 = vpack.c.bf16 %v2966_v39, %v2966_v39  ;;  %v2093_v46 = vadd.f32 %v5113_v33, %v2029_v43  ;;  %v2839_v47 = vadd.f32 %v5113_v33, %v2775_v44 }
 0x28e   :  { %3095 = vst.msk [vmem:[%s5427_s4 + $0xf8] sm:$0xf] %vm3032_vm3, %v3030_v45  ;;  %v2157_v49 = vmax.f32 %v2093_v46, 0.0  ;;  %v2903_v51 = vmax.f32 %v2839_v47, 0.0 }
 0x290   :  { %v2221_v50 = vmax.f32 %v1475_v48, %v2157_v49 }
 0x292   :  { %v2967_v52 = vmax.f32 %v2221_v50, %v2903_v51 }
 0x294   :  { %v3031_v40 = vpack.c.bf16 %v2967_v52, %v2967_v52 }
 0x296   :  { %3096 = vst.msk [vmem:[%s5427_s4 + $0xfc] sm:$0xf] %vm3032_vm3, %v3031_v40 }

</bundles_post_ra>
